<compile_context>
chip_gen: v7x
topology: tpu7x:2x2x1
jax: 0.10.0
libtpu: 0.0.40
codegen_flags: <defaults>
</compile_context>

<pallas_src>
import functools

import jax
import jax.numpy as jnp
import numpy as np
from jax.experimental import pallas as pl
from jax.experimental.pallas import tpu as pltpu


# ----------------------------------------------------------------------------
# Helpers
# ----------------------------------------------------------------------------
def _vmem_limit():
    """VMEM budget from the actual chip (review: don't hard-code 32 MiB)."""
    try:
        cap = int(pltpu.get_tpu_info().vmem_capacity_bytes)
        return max(32 * 1024 * 1024, min((cap * 3) // 4, 96 * 1024 * 1024))
    except Exception:  # pragma: no cover - conservative fallback
        return 64 * 1024 * 1024


def _layernorm(z, w, b, eps=1e-5):
    # PyTorch nn.LayerNorm: biased variance, eps inside sqrt.  Kept in f32.
    mu = jnp.mean(z, axis=-1, keepdims=True)
    var = jnp.mean((z - mu) ** 2, axis=-1, keepdims=True)
    return (z - mu) * jax.lax.rsqrt(var + eps) * w + b


# ----------------------------------------------------------------------------
# Fused transformer-blocks kernel: grid = (depth, batch)
# ----------------------------------------------------------------------------
def gblocks_kernel(x_ref, mask_ref, wq_ref, wk_ref, wv_ref, wu_ref,
                   w1_ref, b1_ref, w2_ref, small_ref, o_ref, *, heads, emb):
    d = pl.program_id(0)          # layer index (outer, "arbitrary")
    bb = pl.program_id(1)         # batch row (inner; weights stay resident)
    T = x_ref.shape[1]
    s = emb // heads

    # Layer 0: seed the resident residual stream (held in the output block,
    # constant index_map -> stays in VMEM for the whole grid).
    @pl.when(d == 0)
    def _():
        o_ref[bb] = x_ref[bb]

    x = o_ref[bb]                                      # (T, E) f32 residual
    x_bf = x.astype(jnp.bfloat16)

    # Packed small per-layer params (f32): [bu, b2, ln1w, ln1b, ln2w, ln2b].
    sm = small_ref[0]                                  # (6, E)
    bu, b2 = sm[0:1], sm[1:2]
    ln1w, ln1b, ln2w, ln2b = sm[2:3], sm[3:4], sm[4:5], sm[5:6]

    # --- narrow multi-head self-attention -----------------------------------
    # Block-diagonal (E, E) bf16 projections (q/k scale folded in) -> single
    # full-width MXU matmuls, f32 accumulation.
    q = jnp.dot(x_bf, wq_ref[0], preferred_element_type=jnp.float32).astype(jnp.bfloat16)
    k = jnp.dot(x_bf, wk_ref[0], preferred_element_type=jnp.float32).astype(jnp.bfloat16)
    v = jnp.dot(x_bf, wv_ref[0], preferred_element_type=jnp.float32).astype(jnp.bfloat16)

    mask = mask_ref[...]                               # (T, T) additive bias

    # Per-head attention with the unify-heads projection accumulated head by
    # head -> no jnp.stack / jnp.concatenate relayouts at all.
    attn = jnp.zeros((T, emb), jnp.float32)
    for h in range(heads):
        lo = h * s
        qh, kh, vh = q[:, lo:lo + s], k[:, lo:lo + s], v[:, lo:lo + s]
        # scores = qh @ kh^T (contract last dims; no transpose op needed)
        sc = jax.lax.dot_general(qh, kh, (((1,), (1,)), ((), ())),
                                 preferred_element_type=jnp.float32)
        sc = sc + mask                                  # causal mask (additive)
        sc = sc - jnp.max(sc, axis=-1, keepdims=True)   # f32 softmax
        p = jnp.exp(sc)
        p = p * pl.reciprocal(jnp.sum(p, axis=-1, keepdims=True), approx=True)
        ctx = jnp.dot(p.astype(jnp.bfloat16), vh,
                      preferred_element_type=jnp.float32)        # (T, s)
        attn = attn + jnp.dot(ctx.astype(jnp.bfloat16), wu_ref[0, h],
                              preferred_element_type=jnp.float32)  # (T, E)
    attn = attn + bu

    # residual + layernorm1 (f32)
    y = _layernorm(attn + x, ln1w, ln1b)

    # feed-forward (4x hidden, ReLU); bf16 weights, f32 accumulation.
    ff = jnp.dot(y.astype(jnp.bfloat16), w1_ref[0],
                 preferred_element_type=jnp.float32) + b1_ref[0]
    ff = jnp.maximum(ff, 0.0)
    ff = jnp.dot(ff.astype(jnp.bfloat16), w2_ref[0],
                 preferred_element_type=jnp.float32) + b2

    # residual + layernorm2 (dropout p=0 -> identity)
    z = _layernorm(ff + y, ln2w, ln2b)
    o_ref[bb] = z                                      # carry residual


def transformer_blocks(x, kp, heads):
    B, T, E = x.shape
    depth = kp["wq_bd"].shape[0]

    # Additive causal mask built once (review item: no in-kernel iota/where).
    mask = jnp.triu(jnp.full((T, T), -1e9, jnp.float32), k=1)

    def wspec(a):
        nd = a.ndim
        return pl.BlockSpec((1,) + a.shape[1:],
                            lambda d, b, _nd=nd: (d,) + (0,) * (_nd - 1))

    ins = [x, mask, kp["wq_bd"], kp["wk_bd"], kp["wv_bd"], kp["wu_h"],
           kp["w1_t"], kp["b1"], kp["w2_t"], kp["small"]]
    in_specs = [
        pl.BlockSpec((B, T, E), lambda d, b: (0, 0, 0)),   # x: resident, 1 DMA
        pl.BlockSpec((T, T), lambda d, b: (0, 0)),         # mask: resident
    ] + [wspec(a) for a in ins[2:]]                        # weights: per-layer

    return pl.pallas_call(
        functools.partial(gblocks_kernel, heads=heads, emb=E),
        out_shape=jax.ShapeDtypeStruct((B, T, E), jnp.float32),
        grid=(depth, B),
        in_specs=in_specs,
        # Constant index -> output doubles as the VMEM-resident residual
        # stream; written back to HBM exactly once at the end of the grid.
        out_specs=pl.BlockSpec((B, T, E), lambda d, b: (0, 0, 0)),
        compiler_params=pltpu.CompilerParams(
            # depth carries the residual chain and the weights must stay
            # resident across the inner batch loop -> both axes "arbitrary".
            dimension_semantics=("arbitrary", "arbitrary"),
            vmem_limit_bytes=_vmem_limit()),
    )(*ins)


# ----------------------------------------------------------------------------
# Output head: vocab-tiled logits + online log-sum-exp
# ----------------------------------------------------------------------------
def output_head_kernel(x_ref, w_ref, b_ref, o_ref, m_sc, l_sc):
    j = pl.program_id(1)
    vb = w_ref.shape[1]

    @pl.when(j == 0)
    def _():
        m_sc[...] = jnp.full(m_sc.shape, -1e30, jnp.float32)
        l_sc[...] = jnp.zeros(l_sc.shape, jnp.float32)

    x = x_ref[0].astype(jnp.bfloat16)                       # (T, E)
    logits = jnp.dot(x, w_ref[...],
                     preferred_element_type=jnp.float32) + b_ref[...]  # (T,vb)

    # Online max / sum-exp accumulation across vocab tiles.
    m_prev = m_sc[...]
    m_new = jnp.maximum(m_prev, jnp.max(logits, axis=-1, keepdims=True))
    l_sc[...] = (l_sc[...] * jnp.exp(m_prev - m_new) +
                 jnp.sum(jnp.exp(logits - m_new), axis=-1, keepdims=True))
    m_sc[...] = m_new

    col = pl.multiple_of(j * vb, 128)
    o_ref[0, :, pl.ds(col, vb)] = logits                    # raw logits tile

    @pl.when(j == pl.num_programs(1) - 1)
    def _():
        lse = m_sc[...] + jnp.log(l_sc[...])                # exact LSE (f32)
        o_ref[0] = o_ref[0] - lse                           # log_softmax


def output_head(x, wout_t_pad, bout_pad, vocab, vb=128):
    B, T, E = x.shape
    Vp = wout_t_pad.shape[1]
    nv = Vp // vb
    out = pl.pallas_call(
        output_head_kernel,
        out_shape=jax.ShapeDtypeStruct((B, T, Vp), jnp.float32),
        grid=(B, nv),
        in_specs=[pl.BlockSpec((1, T, E), lambda b, j: (b, 0, 0)),
                  pl.BlockSpec((E, vb), lambda b, j: (0, j)),
                  pl.BlockSpec((1, vb), lambda b, j: (0, j))],
        # Per-row logits block stays resident across the vocab axis.
        out_specs=pl.BlockSpec((1, T, Vp), lambda b, j: (b, 0, 0)),
        scratch_shapes=[pltpu.VMEM((T, 1), jnp.float32),    # running max
                        pltpu.VMEM((T, 1), jnp.float32)],   # running sum-exp
        compiler_params=pltpu.CompilerParams(
            dimension_semantics=("parallel", "arbitrary"),
            vmem_limit_bytes=_vmem_limit()),
    )(x, wout_t_pad, bout_pad)
    return out[..., :vocab]


def gtransformer_forward(tokens_idx, params, kernel_params, heads):
    # Embedding gathers + positional add are glue (plain JAX).
    tok = params["token_emb"][tokens_idx]                   # (B, T, E)
    T = tokens_idx.shape[1]
    x = tok + params["pos_emb"][:T][None, :, :]
    x = transformer_blocks(x, kernel_params, heads)
    return output_head(x, kernel_params["wout_t"], kernel_params["bout"],
                       kernel_params["vocab"])


# ----------------------------------------------------------------------------
# Host-side parameter preparation (layout plumbing, done once)
# ----------------------------------------------------------------------------
def prepare_kernel_params(params, heads):
    emb = params["blocks"][0]["wu"].shape[0]
    s = emb // heads
    scale = 1.0 / (float(emb) ** 0.25)
    eye = jnp.eye(heads, dtype=jnp.float32)

    def stack(fn):
        return jnp.stack([fn(bp) for bp in params["blocks"]], axis=0)

    kp = {
        # Block-diagonal per-head projections; q/k scaling folded in; bf16.
        "wq_bd": stack(lambda p: jnp.kron(eye, p["wq"].T) * scale).astype(jnp.bfloat16),
        "wk_bd": stack(lambda p: jnp.kron(eye, p["wk"].T) * scale).astype(jnp.bfloat16),
        "wv_bd": stack(lambda p: jnp.kron(eye, p["wv"].T)).astype(jnp.bfloat16),
        # Unify-heads weight as (depth, H, s, E): per-head accumulation in-kernel.
        "wu_h": stack(lambda p: p["wu"].T.reshape(heads, s, emb)).astype(jnp.bfloat16),
        # FFN weights stored (in, out), bf16.
        "w1_t": stack(lambda p: p["w1"].T).astype(jnp.bfloat16),
        "w2_t": stack(lambda p: p["w2"].T).astype(jnp.bfloat16),
        "b1":   stack(lambda p: p["b1"]),                                  # f32
        # Packed small params: [bu, b2, ln1w, ln1b, ln2w, ln2b] -> (depth,6,E).
        "small": stack(lambda p: jnp.concatenate(
            [p["bu"], p["b2"], p["ln1w"], p["ln1b"], p["ln2w"], p["ln2b"]],
            axis=0)),
    }

    # Output head: pad vocab to a multiple of 128 for lane-dense tiles; padded
    # columns get bias -1e9 so they contribute ~0 to the softmax sum.
    V, E = params["wout"].shape
    Vp = ((V + 127) // 128) * 128
    kp["wout_t"] = (jnp.zeros((E, Vp), jnp.float32)
                    .at[:, :V].set(params["wout"].T)).astype(jnp.bfloat16)
    kp["bout"] = jnp.full((1, Vp), -1e9, jnp.float32).at[:, :V].set(params["bout"])
    kp["vocab"] = V
    return kp


# ----------------------------------------------------------------------------
# Deterministic parameter init (synthetic; PyTorch-style layouts/shapes)
# ----------------------------------------------------------------------------
def init_params(key, *, emb, heads, depth, seq_length, num_tokens):
    s = emb // heads
    hid = 4 * emb
    keys = iter(jax.random.split(key, 8 + depth * 8))

    def rnd(shape, scale=0.1):
        return jax.random.normal(next(keys), shape, dtype=jnp.float32) * scale

    params = {
        "token_emb": rnd((num_tokens, emb), 1.0),
        "pos_emb": rnd((seq_length, emb), 1.0),
        "wout": rnd((num_tokens, emb)),
        "bout": rnd((1, num_tokens)),
        "blocks": [],
    }
    for _ in range(depth):
        params["blocks"].append({
            "wq": rnd((s, s)), "wk": rnd((s, s)), "wv": rnd((s, s)),
            "wu": rnd((emb, emb)), "bu": rnd((1, emb)),
            "ln1w": jnp.ones((1, emb), jnp.float32),
            "ln1b": jnp.zeros((1, emb), jnp.float32),
            "w1": rnd((hid, emb)), "b1": rnd((1, hid)),
            "w2": rnd((emb, hid)), "b2": rnd((1, emb)),
            "ln2w": jnp.ones((1, emb), jnp.float32),
            "ln2b": jnp.zeros((1, emb), jnp.float32),
        })
    return params


# ----------------------------------------------------------------------------
# Pure-JAX f32 reference (mirrors the PyTorch forward) for a correctness check
# ----------------------------------------------------------------------------
def ref_forward(tokens_idx, params, heads):
    tok = params["token_emb"][tokens_idx]
    B, T, E = tok.shape
    x = tok + params["pos_emb"][:T][None]
    s = E // heads
    scale = 1.0 / (float(E) ** 0.25)
    mask = jnp.triu(jnp.ones((T, T), bool), k=1)
    for p in params["blocks"]:
        x4 = x.reshape(B, T, heads, s)
        q = jnp.einsum("bths,ps->bthp", x4, p["wq"]) * scale
        k = jnp.einsum("bths,ps->bthp", x4, p["wk"]) * scale
        v = jnp.einsum("bths,ps->bthp", x4, p["wv"])
        dot = jnp.einsum("bqhs,bkhs->bhqk", q, k)
        dot = jnp.where(mask, -jnp.inf, dot)
        att = jax.nn.softmax(dot, axis=-1)
        out = jnp.einsum("bhqk,bkhs->bqhs", att, v).reshape(B, T, E)
        attn = out @ p["wu"].T + p["bu"]
        y = _layernorm(attn + x, p["ln1w"], p["ln1b"])
        ff = jax.nn.relu(y @ p["w1"].T + p["b1"])
        ff = ff @ p["w2"].T + p["b2"]
        x = _layernorm(ff + y, p["ln2w"], p["ln2b"])
    logits = x @ params["wout"].T + params["bout"]
    return jax.nn.log_softmax(logits, axis=-1)


# ----------------------------------------------------------------------------
if __name__ == "__main__":
    EMB, HEADS, DEPTH, SEQ, VOCAB, BATCH = 32, 4, 2, 8, 50, 2

    key = jax.random.PRNGKey(0)
    pkey, xkey = jax.random.split(key)
    params = init_params(pkey, emb=EMB, heads=HEADS, depth=DEPTH,
                         seq_length=SEQ, num_tokens=VOCAB)
    kparams = prepare_kernel_params(params, HEADS)
    x = jax.random.randint(xkey, (BATCH, SEQ), 0, VOCAB, dtype=jnp.int32)

    out = jax.block_until_ready(gtransformer_forward(x, params, kparams, HEADS))

    ref = jax.block_until_ready(ref_forward(x, params, HEADS))
    assert out.shape == (BATCH, SEQ, VOCAB)
    # Tolerances reflect bf16 MXU inputs (f32 accumulation) vs an f32 reference.
    np.testing.assert_allclose(np.asarray(out), np.asarray(ref),
                               rtol=2e-2, atol=2e-2)
    # rows of log_softmax must sum (in prob space) to 1 (exact f32 LSE path).
    np.testing.assert_allclose(np.exp(np.asarray(out)).sum(-1), 1.0, atol=1e-4)

    print("KERNEL_OK")
</pallas_src>

<mosaic_0001>
module attributes {stable_mosaic.version = 11 : i64} {
  func.func @gblocks_kernel(%arg0: i32, %arg1: i32, %arg2: memref<2x8x32xf32, #tpu.memory_space<vmem>>, %arg3: memref<8x8xf32, #tpu.memory_space<vmem>>, %arg4: memref<1x32x32xbf16, #tpu.memory_space<vmem>>, %arg5: memref<1x32x32xbf16, #tpu.memory_space<vmem>>, %arg6: memref<1x32x32xbf16, #tpu.memory_space<vmem>>, %arg7: memref<1x4x8x32xbf16, #tpu.memory_space<vmem>>, %arg8: memref<1x32x128xbf16, #tpu.memory_space<vmem>>, %arg9: memref<1x1x128xf32, #tpu.memory_space<vmem>>, %arg10: memref<1x128x32xbf16, #tpu.memory_space<vmem>>, %arg11: memref<1x6x32xf32, #tpu.memory_space<vmem>>, %arg12: memref<2x8x32xf32, #tpu.memory_space<vmem>>) attributes {dimension_semantics = [#tpu.dimension_semantics<arbitrary>, #tpu.dimension_semantics<arbitrary>], iteration_bounds = array<i64: 2, 2>, scalar_prefetch = 0 : i64, scratch_operands = 0 : i64, tpu.core_type = #tpu.core_type<tc>, window_params = [{pipeline_mode = #tpu.pipeline_mode<synchronous>, transform_indices = @transform_0, window_bounds = array<i64: 2, 8, 32>}, {pipeline_mode = #tpu.pipeline_mode<synchronous>, transform_indices = @transform_1, window_bounds = array<i64: 8, 8>}, {transform_indices = @transform_2, window_bounds = array<i64: 1, 32, 32>}, {transform_indices = @transform_3, window_bounds = array<i64: 1, 32, 32>}, {transform_indices = @transform_4, window_bounds = array<i64: 1, 32, 32>}, {transform_indices = @transform_5, window_bounds = array<i64: 1, 4, 8, 32>}, {transform_indices = @transform_6, window_bounds = array<i64: 1, 32, 128>}, {transform_indices = @transform_7, window_bounds = array<i64: 1, 1, 128>}, {transform_indices = @transform_8, window_bounds = array<i64: 1, 128, 32>}, {transform_indices = @transform_9, window_bounds = array<i64: 1, 6, 32>}, {pipeline_mode = #tpu.pipeline_mode<synchronous>, transform_indices = @transform_10, window_bounds = array<i64: 2, 8, 32>}]} {
    %c0_i32 = arith.constant 0 : i32
    %0 = arith.cmpi eq, %arg0, %c0_i32 : i32
    %1 = arith.extui %0 : i1 to i32
    %c0_i32_0 = arith.constant 0 : i32
    %2 = arith.cmpi ne, %1, %c0_i32_0 : i32
    scf.if %2 {
      %185 = arith.index_cast %arg1 : i32 to index
      %c0_76 = arith.constant 0 : index
      %c0_77 = arith.constant 0 : index
      %186 = vector.load %arg2[%185, %c0_76, %c0_77] : memref<2x8x32xf32, #tpu.memory_space<vmem>>, vector<1x8x32xf32>
      %187 = vector.shape_cast %186 : vector<1x8x32xf32> to vector<8x32xf32>
      %188 = arith.index_cast %arg1 : i32 to index
      %c0_78 = arith.constant 0 : index
      %c0_79 = arith.constant 0 : index
      %189 = vector.load %arg12[%188, %c0_78, %c0_79] : memref<2x8x32xf32, #tpu.memory_space<vmem>>, vector<1x8x32xf32>
      %190 = vector.shape_cast %189 : vector<1x8x32xf32> to vector<8x32xf32>
      %191 = vector.shape_cast %187 : vector<8x32xf32> to vector<1x8x32xf32>
      tpu.vector_store %arg12[%188, %c0_78, %c0_79], %191 {strides = array<i32>} : memref<2x8x32xf32, #tpu.memory_space<vmem>>, vector<1x8x32xf32>,
    } else {
    }
    %3 = arith.index_cast %arg1 : i32 to index
    %c0 = arith.constant 0 : index
    %c0_1 = arith.constant 0 : index
    %4 = vector.load %arg12[%3, %c0, %c0_1] : memref<2x8x32xf32, #tpu.memory_space<vmem>>, vector<1x8x32xf32>
    %5 = vector.shape_cast %4 : vector<1x8x32xf32> to vector<8x32xf32>
    %6 = arith.truncf %5 : vector<8x32xf32> to vector<8x32xbf16>
    %c0_2 = arith.constant 0 : index
    %c0_3 = arith.constant 0 : index
    %c0_4 = arith.constant 0 : index
    %7 = vector.load %arg11[%c0_2, %c0_3, %c0_4] : memref<1x6x32xf32, #tpu.memory_space<vmem>>, vector<1x6x32xf32>
    %8 = vector.shape_cast %7 : vector<1x6x32xf32> to vector<6x32xf32>
    %9 = vector.extract_strided_slice %8 {offsets = [0, 0], sizes = [1, 32], strides = [1, 1]} : vector<6x32xf32> to vector<1x32xf32>
    %10 = vector.extract_strided_slice %8 {offsets = [1, 0], sizes = [1, 32], strides = [1, 1]} : vector<6x32xf32> to vector<1x32xf32>
    %11 = vector.extract_strided_slice %8 {offsets = [2, 0], sizes = [1, 32], strides = [1, 1]} : vector<6x32xf32> to vector<1x32xf32>
    %12 = vector.extract_strided_slice %8 {offsets = [3, 0], sizes = [1, 32], strides = [1, 1]} : vector<6x32xf32> to vector<1x32xf32>
    %13 = vector.extract_strided_slice %8 {offsets = [4, 0], sizes = [1, 32], strides = [1, 1]} : vector<6x32xf32> to vector<1x32xf32>
    %14 = vector.extract_strided_slice %8 {offsets = [5, 0], sizes = [1, 32], strides = [1, 1]} : vector<6x32xf32> to vector<1x32xf32>
    %c0_5 = arith.constant 0 : index
    %c0_6 = arith.constant 0 : index
    %c0_7 = arith.constant 0 : index
    %15 = vector.load %arg4[%c0_5, %c0_6, %c0_7] : memref<1x32x32xbf16, #tpu.memory_space<vmem>>, vector<1x32x32xbf16>
    %16 = vector.shape_cast %15 : vector<1x32x32xbf16> to vector<32x32xbf16>
    %cst = arith.constant dense<0.000000e+00> : vector<8x32xf32>
    %17 = tpu.matmul %6, %16, %cst {dimension_numbers = #tpu.dot_dimension_numbers<[1], [0], [0], [1], [0, 0, 1, 1], [], []>} : vector<8x32xbf16>, vector<32x32xbf16>, vector<8x32xf32> -> vector<8x32xf32>
    %18 = arith.truncf %17 : vector<8x32xf32> to vector<8x32xbf16>
    %c0_8 = arith.constant 0 : index
    %c0_9 = arith.constant 0 : index
    %c0_10 = arith.constant 0 : index
    %19 = vector.load %arg5[%c0_8, %c0_9, %c0_10] : memref<1x32x32xbf16, #tpu.memory_space<vmem>>, vector<1x32x32xbf16>
    %20 = vector.shape_cast %19 : vector<1x32x32xbf16> to vector<32x32xbf16>
    %cst_11 = arith.constant dense<0.000000e+00> : vector<8x32xf32>
    %21 = tpu.matmul %6, %20, %cst_11 {dimension_numbers = #tpu.dot_dimension_numbers<[1], [0], [0], [1], [0, 0, 1, 1], [], []>} : vector<8x32xbf16>, vector<32x32xbf16>, vector<8x32xf32> -> vector<8x32xf32>
    %22 = arith.truncf %21 : vector<8x32xf32> to vector<8x32xbf16>
    %c0_12 = arith.constant 0 : index
    %c0_13 = arith.constant 0 : index
    %c0_14 = arith.constant 0 : index
    %23 = vector.load %arg6[%c0_12, %c0_13, %c0_14] : memref<1x32x32xbf16, #tpu.memory_space<vmem>>, vector<1x32x32xbf16>
    %24 = vector.shape_cast %23 : vector<1x32x32xbf16> to vector<32x32xbf16>
    %cst_15 = arith.constant dense<0.000000e+00> : vector<8x32xf32>
    %25 = tpu.matmul %6, %24, %cst_15 {dimension_numbers = #tpu.dot_dimension_numbers<[1], [0], [0], [1], [0, 0, 1, 1], [], []>} : vector<8x32xbf16>, vector<32x32xbf16>, vector<8x32xf32> -> vector<8x32xf32>
    %26 = arith.truncf %25 : vector<8x32xf32> to vector<8x32xbf16>
    %c0_16 = arith.constant 0 : index
    %c0_17 = arith.constant 0 : index
    %27 = vector.load %arg3[%c0_16, %c0_17] : memref<8x8xf32, #tpu.memory_space<vmem>>, vector<8x8xf32>
    %cst_18 = arith.constant 0.000000e+00 : f32
    %28 = vector.broadcast %cst_18 : f32 to vector<8x32xf32>
    %29 = vector.extract_strided_slice %18 {offsets = [0, 0], sizes = [8, 8], strides = [1, 1]} : vector<8x32xbf16> to vector<8x8xbf16>
    %30 = vector.extract_strided_slice %22 {offsets = [0, 0], sizes = [8, 8], strides = [1, 1]} : vector<8x32xbf16> to vector<8x8xbf16>
    %31 = vector.extract_strided_slice %26 {offsets = [0, 0], sizes = [8, 8], strides = [1, 1]} : vector<8x32xbf16> to vector<8x8xbf16>
    %cst_19 = arith.constant dense<0.000000e+00> : vector<8x8xf32>
    %32 = tpu.matmul %29, %30, %cst_19 {dimension_numbers = #tpu.dot_dimension_numbers<[1], [1], [0], [0], [0, 0, 1, 0], [], []>} : vector<8x8xbf16>, vector<8x8xbf16>, vector<8x8xf32> -> vector<8x8xf32>
    %33 = arith.addf %32, %27 : vector<8x8xf32>
    %cst_20 = arith.constant dense<0xFF800000> : vector<8xf32>
    %34 = vector.multi_reduction <maximumf>, %33, %cst_20 [1] : vector<8x8xf32> to vector<8xf32>
    %35 = vector.shape_cast %34 : vector<8xf32> to vector<8x1xf32>
    %36 = vector.broadcast %35 : vector<8x1xf32> to vector<8x8xf32>
    %37 = arith.subf %33, %36 : vector<8x8xf32>
    %38 = math.exp %37 : vector<8x8xf32>
    %cst_21 = arith.constant dense<0.000000e+00> : vector<8xf32>
    %39 = vector.multi_reduction <add>, %38, %cst_21 [1] : vector<8x8xf32> to vector<8xf32>
    %40 = vector.shape_cast %39 : vector<8xf32> to vector<8x1xf32>
    %41 = tpu.reciprocal %40 {approx = true} : vector<8x1xf32> -> vector<8x1xf32>
    %42 = vector.broadcast %41 : vector<8x1xf32> to vector<8x8xf32>
    %43 = arith.mulf %38, %42 : vector<8x8xf32>
    %44 = arith.truncf %43 : vector<8x8xf32> to vector<8x8xbf16>
    %cst_22 = arith.constant dense<0.000000e+00> : vector<8x8xf32>
    %45 = tpu.matmul %44, %31, %cst_22 {dimension_numbers = #tpu.dot_dimension_numbers<[1], [0], [0], [1], [0, 0, 1, 1], [], []>} : vector<8x8xbf16>, vector<8x8xbf16>, vector<8x8xf32> -> vector<8x8xf32>
    %46 = arith.truncf %45 : vector<8x8xf32> to vector<8x8xbf16>
    %c0_23 = arith.constant 0 : index
    %c0_24 = arith.constant 0 : index
    %c0_25 = arith.constant 0 : index
    %c0_26 = arith.constant 0 : index
    %47 = vector.load %arg7[%c0_23, %c0_24, %c0_25, %c0_26] : memref<1x4x8x32xbf16, #tpu.memory_space<vmem>>, vector<1x1x8x32xbf16>
    %48 = vector.shape_cast %47 : vector<1x1x8x32xbf16> to vector<8x32xbf16>
    %cst_27 = arith.constant dense<0.000000e+00> : vector<8x32xf32>
    %49 = tpu.matmul %46, %48, %cst_27 {dimension_numbers = #tpu.dot_dimension_numbers<[1], [0], [0], [1], [0, 0, 1, 1], [], []>} : vector<8x8xbf16>, vector<8x32xbf16>, vector<8x32xf32> -> vector<8x32xf32>
    %50 = arith.addf %28, %49 : vector<8x32xf32>
    %51 = vector.extract_strided_slice %18 {offsets = [0, 8], sizes = [8, 8], strides = [1, 1]} : vector<8x32xbf16> to vector<8x8xbf16>
    %52 = vector.extract_strided_slice %22 {offsets = [0, 8], sizes = [8, 8], strides = [1, 1]} : vector<8x32xbf16> to vector<8x8xbf16>
    %53 = vector.extract_strided_slice %26 {offsets = [0, 8], sizes = [8, 8], strides = [1, 1]} : vector<8x32xbf16> to vector<8x8xbf16>
    %cst_28 = arith.constant dense<0.000000e+00> : vector<8x8xf32>
    %54 = tpu.matmul %51, %52, %cst_28 {dimension_numbers = #tpu.dot_dimension_numbers<[1], [1], [0], [0], [0, 0, 1, 0], [], []>} : vector<8x8xbf16>, vector<8x8xbf16>, vector<8x8xf32> -> vector<8x8xf32>
    %55 = arith.addf %54, %27 : vector<8x8xf32>
    %cst_29 = arith.constant dense<0xFF800000> : vector<8xf32>
    %56 = vector.multi_reduction <maximumf>, %55, %cst_29 [1] : vector<8x8xf32> to vector<8xf32>
    %57 = vector.shape_cast %56 : vector<8xf32> to vector<8x1xf32>
    %58 = vector.broadcast %57 : vector<8x1xf32> to vector<8x8xf32>
    %59 = arith.subf %55, %58 : vector<8x8xf32>
    %60 = math.exp %59 : vector<8x8xf32>
    %cst_30 = arith.constant dense<0.000000e+00> : vector<8xf32>
    %61 = vector.multi_reduction <add>, %60, %cst_30 [1] : vector<8x8xf32> to vector<8xf32>
    %62 = vector.shape_cast %61 : vector<8xf32> to vector<8x1xf32>
    %63 = tpu.reciprocal %62 {approx = true} : vector<8x1xf32> -> vector<8x1xf32>
    %64 = vector.broadcast %63 : vector<8x1xf32> to vector<8x8xf32>
    %65 = arith.mulf %60, %64 : vector<8x8xf32>
    %66 = arith.truncf %65 : vector<8x8xf32> to vector<8x8xbf16>
    %cst_31 = arith.constant dense<0.000000e+00> : vector<8x8xf32>
    %67 = tpu.matmul %66, %53, %cst_31 {dimension_numbers = #tpu.dot_dimension_numbers<[1], [0], [0], [1], [0, 0, 1, 1], [], []>} : vector<8x8xbf16>, vector<8x8xbf16>, vector<8x8xf32> -> vector<8x8xf32>
    %68 = arith.truncf %67 : vector<8x8xf32> to vector<8x8xbf16>
    %c0_32 = arith.constant 0 : index
    %c1 = arith.constant 1 : index
    %c0_33 = arith.constant 0 : index
    %c0_34 = arith.constant 0 : index
    %69 = vector.load %arg7[%c0_32, %c1, %c0_33, %c0_34] : memref<1x4x8x32xbf16, #tpu.memory_space<vmem>>, vector<1x1x8x32xbf16>
    %70 = vector.shape_cast %69 : vector<1x1x8x32xbf16> to vector<8x32xbf16>
    %cst_35 = arith.constant dense<0.000000e+00> : vector<8x32xf32>
    %71 = tpu.matmul %68, %70, %cst_35 {dimension_numbers = #tpu.dot_dimension_numbers<[1], [0], [0], [1], [0, 0, 1, 1], [], []>} : vector<8x8xbf16>, vector<8x32xbf16>, vector<8x32xf32> -> vector<8x32xf32>
    %72 = arith.addf %50, %71 : vector<8x32xf32>
    %73 = vector.extract_strided_slice %18 {offsets = [0, 16], sizes = [8, 8], strides = [1, 1]} : vector<8x32xbf16> to vector<8x8xbf16>
    %74 = vector.extract_strided_slice %22 {offsets = [0, 16], sizes = [8, 8], strides = [1, 1]} : vector<8x32xbf16> to vector<8x8xbf16>
    %75 = vector.extract_strided_slice %26 {offsets = [0, 16], sizes = [8, 8], strides = [1, 1]} : vector<8x32xbf16> to vector<8x8xbf16>
    %cst_36 = arith.constant dense<0.000000e+00> : vector<8x8xf32>
    %76 = tpu.matmul %73, %74, %cst_36 {dimension_numbers = #tpu.dot_dimension_numbers<[1], [1], [0], [0], [0, 0, 1, 0], [], []>} : vector<8x8xbf16>, vector<8x8xbf16>, vector<8x8xf32> -> vector<8x8xf32>
    %77 = arith.addf %76, %27 : vector<8x8xf32>
    %cst_37 = arith.constant dense<0xFF800000> : vector<8xf32>
    %78 = vector.multi_reduction <maximumf>, %77, %cst_37 [1] : vector<8x8xf32> to vector<8xf32>
    %79 = vector.shape_cast %78 : vector<8xf32> to vector<8x1xf32>
    %80 = vector.broadcast %79 : vector<8x1xf32> to vector<8x8xf32>
    %81 = arith.subf %77, %80 : vector<8x8xf32>
    %82 = math.exp %81 : vector<8x8xf32>
    %cst_38 = arith.constant dense<0.000000e+00> : vector<8xf32>
    %83 = vector.multi_reduction <add>, %82, %cst_38 [1] : vector<8x8xf32> to vector<8xf32>
    %84 = vector.shape_cast %83 : vector<8xf32> to vector<8x1xf32>
    %85 = tpu.reciprocal %84 {approx = true} : vector<8x1xf32> -> vector<8x1xf32>
    %86 = vector.broadcast %85 : vector<8x1xf32> to vector<8x8xf32>
    %87 = arith.mulf %82, %86 : vector<8x8xf32>
    %88 = arith.truncf %87 : vector<8x8xf32> to vector<8x8xbf16>
    %cst_39 = arith.constant dense<0.000000e+00> : vector<8x8xf32>
    %89 = tpu.matmul %88, %75, %cst_39 {dimension_numbers = #tpu.dot_dimension_numbers<[1], [0], [0], [1], [0, 0, 1, 1], [], []>} : vector<8x8xbf16>, vector<8x8xbf16>, vector<8x8xf32> -> vector<8x8xf32>
    %90 = arith.truncf %89 : vector<8x8xf32> to vector<8x8xbf16>
    %c0_40 = arith.constant 0 : index
    %c2 = arith.constant 2 : index
    %c0_41 = arith.constant 0 : index
    %c0_42 = arith.constant 0 : index
    %91 = vector.load %arg7[%c0_40, %c2, %c0_41, %c0_42] : memref<1x4x8x32xbf16, #tpu.memory_space<vmem>>, vector<1x1x8x32xbf16>
    %92 = vector.shape_cast %91 : vector<1x1x8x32xbf16> to vector<8x32xbf16>
    %cst_43 = arith.constant dense<0.000000e+00> : vector<8x32xf32>
    %93 = tpu.matmul %90, %92, %cst_43 {dimension_numbers = #tpu.dot_dimension_numbers<[1], [0], [0], [1], [0, 0, 1, 1], [], []>} : vector<8x8xbf16>, vector<8x32xbf16>, vector<8x32xf32> -> vector<8x32xf32>
    %94 = arith.addf %72, %93 : vector<8x32xf32>
    %95 = vector.extract_strided_slice %18 {offsets = [0, 24], sizes = [8, 8], strides = [1, 1]} : vector<8x32xbf16> to vector<8x8xbf16>
    %96 = vector.extract_strided_slice %22 {offsets = [0, 24], sizes = [8, 8], strides = [1, 1]} : vector<8x32xbf16> to vector<8x8xbf16>
    %97 = vector.extract_strided_slice %26 {offsets = [0, 24], sizes = [8, 8], strides = [1, 1]} : vector<8x32xbf16> to vector<8x8xbf16>
    %cst_44 = arith.constant dense<0.000000e+00> : vector<8x8xf32>
    %98 = tpu.matmul %95, %96, %cst_44 {dimension_numbers = #tpu.dot_dimension_numbers<[1], [1], [0], [0], [0, 0, 1, 0], [], []>} : vector<8x8xbf16>, vector<8x8xbf16>, vector<8x8xf32> -> vector<8x8xf32>
    %99 = arith.addf %98, %27 : vector<8x8xf32>
    %cst_45 = arith.constant dense<0xFF800000> : vector<8xf32>
    %100 = vector.multi_reduction <maximumf>, %99, %cst_45 [1] : vector<8x8xf32> to vector<8xf32>
    %101 = vector.shape_cast %100 : vector<8xf32> to vector<8x1xf32>
    %102 = vector.broadcast %101 : vector<8x1xf32> to vector<8x8xf32>
    %103 = arith.subf %99, %102 : vector<8x8xf32>
    %104 = math.exp %103 : vector<8x8xf32>
    %cst_46 = arith.constant dense<0.000000e+00> : vector<8xf32>
    %105 = vector.multi_reduction <add>, %104, %cst_46 [1] : vector<8x8xf32> to vector<8xf32>
    %106 = vector.shape_cast %105 : vector<8xf32> to vector<8x1xf32>
    %107 = tpu.reciprocal %106 {approx = true} : vector<8x1xf32> -> vector<8x1xf32>
    %108 = vector.broadcast %107 : vector<8x1xf32> to vector<8x8xf32>
    %109 = arith.mulf %104, %108 : vector<8x8xf32>
    %110 = arith.truncf %109 : vector<8x8xf32> to vector<8x8xbf16>
    %cst_47 = arith.constant dense<0.000000e+00> : vector<8x8xf32>
    %111 = tpu.matmul %110, %97, %cst_47 {dimension_numbers = #tpu.dot_dimension_numbers<[1], [0], [0], [1], [0, 0, 1, 1], [], []>} : vector<8x8xbf16>, vector<8x8xbf16>, vector<8x8xf32> -> vector<8x8xf32>
    %112 = arith.truncf %111 : vector<8x8xf32> to vector<8x8xbf16>
    %c0_48 = arith.constant 0 : index
    %c3 = arith.constant 3 : index
    %c0_49 = arith.constant 0 : index
    %c0_50 = arith.constant 0 : index
    %113 = vector.load %arg7[%c0_48, %c3, %c0_49, %c0_50] : memref<1x4x8x32xbf16, #tpu.memory_space<vmem>>, vector<1x1x8x32xbf16>
    %114 = vector.shape_cast %113 : vector<1x1x8x32xbf16> to vector<8x32xbf16>
    %cst_51 = arith.constant dense<0.000000e+00> : vector<8x32xf32>
    %115 = tpu.matmul %112, %114, %cst_51 {dimension_numbers = #tpu.dot_dimension_numbers<[1], [0], [0], [1], [0, 0, 1, 1], [], []>} : vector<8x8xbf16>, vector<8x32xbf16>, vector<8x32xf32> -> vector<8x32xf32>
    %116 = arith.addf %94, %115 : vector<8x32xf32>
    %117 = vector.broadcast %9 : vector<1x32xf32> to vector<8x32xf32>
    %118 = arith.addf %116, %117 : vector<8x32xf32>
    %119 = arith.addf %118, %5 : vector<8x32xf32>
    %cst_52 = arith.constant dense<0.000000e+00> : vector<8xf32>
    %120 = vector.multi_reduction <add>, %119, %cst_52 [1] : vector<8x32xf32> to vector<8xf32>
    %121 = vector.shape_cast %120 : vector<8xf32> to vector<8x1xf32>
    %cst_53 = arith.constant 3.200000e+01 : f32
    %122 = vector.broadcast %cst_53 : f32 to vector<8x1xf32>
    %123 = arith.divf %121, %122 : vector<8x1xf32>
    %124 = vector.broadcast %123 : vector<8x1xf32> to vector<8x32xf32>
    %125 = arith.subf %119, %124 : vector<8x32xf32>
    %126 = arith.mulf %125, %125 : vector<8x32xf32>
    %cst_54 = arith.constant dense<0.000000e+00> : vector<8xf32>
    %127 = vector.multi_reduction <add>, %126, %cst_54 [1] : vector<8x32xf32> to vector<8xf32>
    %128 = vector.shape_cast %127 : vector<8xf32> to vector<8x1xf32>
    %cst_55 = arith.constant 3.200000e+01 : f32
    %129 = vector.broadcast %cst_55 : f32 to vector<8x1xf32>
    %130 = arith.divf %128, %129 : vector<8x1xf32>
    %131 = vector.broadcast %123 : vector<8x1xf32> to vector<8x32xf32>
    %132 = arith.subf %119, %131 : vector<8x32xf32>
    %cst_56 = arith.constant 9.99999974E-6 : f32
    %133 = vector.broadcast %cst_56 : f32 to vector<8x1xf32>
    %134 = arith.addf %130, %133 : vector<8x1xf32>
    %135 = math.rsqrt %134 : vector<8x1xf32>
    %136 = vector.broadcast %135 : vector<8x1xf32> to vector<8x32xf32>
    %137 = arith.mulf %132, %136 : vector<8x32xf32>
    %138 = vector.broadcast %11 : vector<1x32xf32> to vector<8x32xf32>
    %139 = arith.mulf %137, %138 : vector<8x32xf32>
    %140 = vector.broadcast %12 : vector<1x32xf32> to vector<8x32xf32>
    %141 = arith.addf %139, %140 : vector<8x32xf32>
    %142 = arith.truncf %141 : vector<8x32xf32> to vector<8x32xbf16>
    %c0_57 = arith.constant 0 : index
    %c0_58 = arith.constant 0 : index
    %c0_59 = arith.constant 0 : index
    %143 = vector.load %arg8[%c0_57, %c0_58, %c0_59] : memref<1x32x128xbf16, #tpu.memory_space<vmem>>, vector<1x32x128xbf16>
    %144 = vector.shape_cast %143 : vector<1x32x128xbf16> to vector<32x128xbf16>
    %cst_60 = arith.constant dense<0.000000e+00> : vector<8x128xf32>
    %145 = tpu.matmul %142, %144, %cst_60 {dimension_numbers = #tpu.dot_dimension_numbers<[1], [0], [0], [1], [0, 0, 1, 1], [], []>} : vector<8x32xbf16>, vector<32x128xbf16>, vector<8x128xf32> -> vector<8x128xf32>
    %c0_61 = arith.constant 0 : index
    %c0_62 = arith.constant 0 : index
    %c0_63 = arith.constant 0 : index
    %146 = vector.load %arg9[%c0_61, %c0_62, %c0_63] : memref<1x1x128xf32, #tpu.memory_space<vmem>>, vector<1x1x128xf32>
    %147 = vector.shape_cast %146 : vector<1x1x128xf32> to vector<1x128xf32>
    %148 = vector.broadcast %147 : vector<1x128xf32> to vector<8x128xf32>
    %149 = arith.addf %145, %148 : vector<8x128xf32>
    %cst_64 = arith.constant 0.000000e+00 : f32
    %150 = vector.broadcast %cst_64 : f32 to vector<8x128xf32>
    %151 = arith.maximumf %149, %150 : vector<8x128xf32>
    %152 = arith.truncf %151 : vector<8x128xf32> to vector<8x128xbf16>
    %c0_65 = arith.constant 0 : index
    %c0_66 = arith.constant 0 : index
    %c0_67 = arith.constant 0 : index
    %153 = vector.load %arg10[%c0_65, %c0_66, %c0_67] : memref<1x128x32xbf16, #tpu.memory_space<vmem>>, vector<1x128x32xbf16>
    %154 = vector.shape_cast %153 : vector<1x128x32xbf16> to vector<128x32xbf16>
    %cst_68 = arith.constant dense<0.000000e+00> : vector<8x32xf32>
    %155 = tpu.matmul %152, %154, %cst_68 {dimension_numbers = #tpu.dot_dimension_numbers<[1], [0], [0], [1], [0, 0, 1, 1], [], []>} : vector<8x128xbf16>, vector<128x32xbf16>, vector<8x32xf32> -> vector<8x32xf32>
    %156 = vector.broadcast %10 : vector<1x32xf32> to vector<8x32xf32>
    %157 = arith.addf %155, %156 : vector<8x32xf32>
    %158 = arith.addf %157, %141 : vector<8x32xf32>
    %cst_69 = arith.constant dense<0.000000e+00> : vector<8xf32>
    %159 = vector.multi_reduction <add>, %158, %cst_69 [1] : vector<8x32xf32> to vector<8xf32>
    %160 = vector.shape_cast %159 : vector<8xf32> to vector<8x1xf32>
    %cst_70 = arith.constant 3.200000e+01 : f32
    %161 = vector.broadcast %cst_70 : f32 to vector<8x1xf32>
    %162 = arith.divf %160, %161 : vector<8x1xf32>
    %163 = vector.broadcast %162 : vector<8x1xf32> to vector<8x32xf32>
    %164 = arith.subf %158, %163 : vector<8x32xf32>
    %165 = arith.mulf %164, %164 : vector<8x32xf32>
    %cst_71 = arith.constant dense<0.000000e+00> : vector<8xf32>
    %166 = vector.multi_reduction <add>, %165, %cst_71 [1] : vector<8x32xf32> to vector<8xf32>
    %167 = vector.shape_cast %166 : vector<8xf32> to vector<8x1xf32>
    %cst_72 = arith.constant 3.200000e+01 : f32
    %168 = vector.broadcast %cst_72 : f32 to vector<8x1xf32>
    %169 = arith.divf %167, %168 : vector<8x1xf32>
    %170 = vector.broadcast %162 : vector<8x1xf32> to vector<8x32xf32>
    %171 = arith.subf %158, %170 : vector<8x32xf32>
    %cst_73 = arith.constant 9.99999974E-6 : f32
    %172 = vector.broadcast %cst_73 : f32 to vector<8x1xf32>
    %173 = arith.addf %169, %172 : vector<8x1xf32>
    %174 = math.rsqrt %173 : vector<8x1xf32>
    %175 = vector.broadcast %174 : vector<8x1xf32> to vector<8x32xf32>
    %176 = arith.mulf %171, %175 : vector<8x32xf32>
    %177 = vector.broadcast %13 : vector<1x32xf32> to vector<8x32xf32>
    %178 = arith.mulf %176, %177 : vector<8x32xf32>
    %179 = vector.broadcast %14 : vector<1x32xf32> to vector<8x32xf32>
    %180 = arith.addf %178, %179 : vector<8x32xf32>
    %181 = arith.index_cast %arg1 : i32 to index
    %c0_74 = arith.constant 0 : index
    %c0_75 = arith.constant 0 : index
    %182 = vector.load %arg12[%181, %c0_74, %c0_75] : memref<2x8x32xf32, #tpu.memory_space<vmem>>, vector<1x8x32xf32>
    %183 = vector.shape_cast %182 : vector<1x8x32xf32> to vector<8x32xf32>
    %184 = vector.shape_cast %180 : vector<8x32xf32> to vector<1x8x32xf32>
    tpu.vector_store %arg12[%181, %c0_74, %c0_75], %184 {strides = array<i32>} : memref<2x8x32xf32, #tpu.memory_space<vmem>>, vector<1x8x32xf32>,
    return
  }
  func.func @transform_0(%arg0: i32, %arg1: i32) -> (i32, i32, i32) {
    %c0_i32 = arith.constant 0 : i32
    %c0_i32_0 = arith.constant 0 : i32
    %c0_i32_1 = arith.constant 0 : i32
    %c0_i32_2 = arith.constant 0 : i32
    return %c0_i32, %c0_i32_0, %c0_i32_1 : i32, i32, i32
  }
  func.func @transform_1(%arg0: i32, %arg1: i32) -> (i32, i32) {
    %c0_i32 = arith.constant 0 : i32
    %c0_i32_0 = arith.constant 0 : i32
    %c0_i32_1 = arith.constant 0 : i32
    return %c0_i32, %c0_i32_0 : i32, i32
  }
  func.func @transform_2(%arg0: i32, %arg1: i32) -> (i32, i32, i32) {
    %c0_i32 = arith.constant 0 : i32
    %c0_i32_0 = arith.constant 0 : i32
    %c0_i32_1 = arith.constant 0 : i32
    return %arg0, %c0_i32, %c0_i32_0 : i32, i32, i32
  }
  func.func @transform_3(%arg0: i32, %arg1: i32) -> (i32, i32, i32) {
    %c0_i32 = arith.constant 0 : i32
    %c0_i32_0 = arith.constant 0 : i32
    %c0_i32_1 = arith.constant 0 : i32
    return %arg0, %c0_i32, %c0_i32_0 : i32, i32, i32
  }
  func.func @transform_4(%arg0: i32, %arg1: i32) -> (i32, i32, i32) {
    %c0_i32 = arith.constant 0 : i32
    %c0_i32_0 = arith.constant 0 : i32
    %c0_i32_1 = arith.constant 0 : i32
    return %arg0, %c0_i32, %c0_i32_0 : i32, i32, i32
  }
  func.func @transform_5(%arg0: i32, %arg1: i32) -> (i32, i32, i32, i32) {
    %c0_i32 = arith.constant 0 : i32
    %c0_i32_0 = arith.constant 0 : i32
    %c0_i32_1 = arith.constant 0 : i32
    %c0_i32_2 = arith.constant 0 : i32
    return %arg0, %c0_i32, %c0_i32_0, %c0_i32_1 : i32, i32, i32, i32
  }
  func.func @transform_6(%arg0: i32, %arg1: i32) -> (i32, i32, i32) {
    %c0_i32 = arith.constant 0 : i32
    %c0_i32_0 = arith.constant 0 : i32
    %c0_i32_1 = arith.constant 0 : i32
    return %arg0, %c0_i32, %c0_i32_0 : i32, i32, i32
  }
  func.func @transform_7(%arg0: i32, %arg1: i32) -> (i32, i32, i32) {
    %c0_i32 = arith.constant 0 : i32
    %c0_i32_0 = arith.constant 0 : i32
    %c0_i32_1 = arith.constant 0 : i32
    return %arg0, %c0_i32, %c0_i32_0 : i32, i32, i32
  }
  func.func @transform_8(%arg0: i32, %arg1: i32) -> (i32, i32, i32) {
    %c0_i32 = arith.constant 0 : i32
    %c0_i32_0 = arith.constant 0 : i32
    %c0_i32_1 = arith.constant 0 : i32
    return %arg0, %c0_i32, %c0_i32_0 : i32, i32, i32
  }
  func.func @transform_9(%arg0: i32, %arg1: i32) -> (i32, i32, i32) {
    %c0_i32 = arith.constant 0 : i32
    %c0_i32_0 = arith.constant 0 : i32
    %c0_i32_1 = arith.constant 0 : i32
    return %arg0, %c0_i32, %c0_i32_0 : i32, i32, i32
  }
  func.func @transform_10(%arg0: i32, %arg1: i32) -> (i32, i32, i32) {
    %c0_i32 = arith.constant 0 : i32
    %c0_i32_0 = arith.constant 0 : i32
    %c0_i32_1 = arith.constant 0 : i32
    %c0_i32_2 = arith.constant 0 : i32
    return %c0_i32, %c0_i32_0, %c0_i32_1 : i32, i32, i32
  }
}

</mosaic_0001>

<bundles_post_ra>
// kernel: tpu_custom_call.1
= control target key start
LH: loop header
LB: loop body
LE: loop exit
PB: predicated region body
PF: predicated region fallthrough
CT: control target
= control target key end

     0   :  { %s3535_s0 = inlined_call_operand.hbm [shape: f32[2,8,32], index: 0, kind: input, shape index: {}]   ;;  %s3536_s1 = inlined_call_operand.hbm [shape: f32[8,8], index: 1, kind: input, shape index: {}]   ;;  %s3537_s2 = inlined_call_operand.hbm [shape: bf16[2,32,32], index: 2, kind: input, shape index: {}]   ;;  %s3538_s3 = inlined_call_operand.hbm [shape: bf16[2,32,32], index: 3, kind: input, shape index: {}]   ;;  %s3539_s4 = inlined_call_operand.hbm [shape: bf16[2,32,32], index: 4, kind: input, shape index: {}]   ;;  %s3540_s5 = inlined_call_operand.hbm [shape: bf16[2,4,8,32], index: 5, kind: input, shape index: {}]   ;;  %s3541_s6 = inlined_call_operand.hbm [shape: bf16[2,32,128], index: 6, kind: input, shape index: {}]   ;;  %s3542_s7 = inlined_call_operand.hbm [shape: f32[2,1,128], index: 7, kind: input, shape index: {}]   ;;  %s3543_s8 = inlined_call_operand.hbm [shape: bf16[2,128,32], index: 8, kind: input, shape index: {}]   ;;  %s3544_s9 = inlined_call_operand.hbm [shape: f32[2,6,32], index: 9, kind: input, shape index: {}]   ;;  %s3545_s10 = inlined_call_operand.hbm [shape: f32[2,8,32], index: 10, kind: output, shape index: {}]  }
   0x1   :  { %3562 = sst [smem:[#allocation28_spill]] %s3535_s0 }
   0x2   :  { %3563 = sst [smem:[#allocation29_spill]] %s3537_s2 }
   0x3   :  { %3564 = sst [smem:[#allocation30_spill]] %s3538_s3 }
   0x4   :  { %3565 = sst [smem:[#allocation31_spill]] %s3539_s4 }
   0x5   :  { %3566 = sst [smem:[#allocation32_spill]] %s3540_s5 }
   0x6   :  { %3567 = sst [smem:[#allocation33_spill]] %s3545_s10 }
   0x7   :  { %15 = vsyncpa [#allocation3], 0 }
   0x8   :  { %16 = vsyncpa [#allocation6], 0 }
   0x9   :  { %17 = vsyncpa [#allocation4], 0  ;;  %s2860_s13 = smov 0   ;;  %s2862_s14 = smov 0  }
   0xa   :  { %s2864_s15 = smov 0   ;;  %s2866_s16 = smov 0  }
   0xb   :  { %s2868_s17 = smov 0   ;;  %s2870_s18 = smov 0  }
   0xc   :  { %s2872_s19 = smov 0   ;;  %s2874_s20 = smov 0  }
   0xd LB: > { %3568 = sst [smem:[#allocation20_spill]] %s2761_s15  ;;  %s2899_s21 = sadd.s32 4294967295, %s2781_s20   ;;  %s2781_s20 = sphi %s2874_s20, %s23_s20   ;;  %s2777_s19 = sphi %s2872_s19, %s3615_s19   ;;  %s2773_s18 = sphi %s2870_s18, %s3610_s18   ;;  %s2769_s17 = sphi %s2868_s17, %s3614_s17   ;;  %s2765_s16 = sphi %s2866_s16, %s3609_s16   ;;  %s2761_s15 = sphi %s2864_s15, %s3608_s15   ;;  %s2757_s14 = sphi %s2862_s14, %s3613_s14   ;;  %s2753_s13 = sphi %s2860_s13, %s3612_s13  }
   0xe   : > { %3569 = sst [smem:[#allocation21_spill]] %s2765_s16  ;;  %s32_s22 = sadd.s32 1, %s2773_s18 }
   0xf   : > { %3570 = sst [smem:[#allocation22_spill]] %s2769_s17  ;;  %p33_p0 = scmp.ge.s32.totalorder %s32_s22, 2 }
  0x10   : > { %3571 = sst [smem:[#allocation23_spill]] %s2773_s18  ;;  %s35_s23 = sadd.s32 1, %s2777_s19 }
  0x11   : > { %3572 = sst [smem:[#allocation24_spill]] %s2781_s20  ;;  %s84_s24 = sadd.s32 1, %s2761_s15 }
  0x12   : > { %p91_p1 = scmp.ne.s32.totalorder %s2761_s15, %s2757_s14  ;;  %s3617_s22 = smov (%p33_p0, %s32_s22), 0 }
  0x13   : > { %3573 = sst [smem:[#allocation25_spill]] %s3617_s22  ;;  %s3619_s23 = smov (!%p33_p0, %s35_s23), %s2777_s19 }
  0x14   : > { %p92_p2 = scmp.eq.s32.totalorder %s2781_s20, 0  ;;  %p97_p3 = scmp.ne.s32.totalorder %s2757_s14, %s2753_s13 }
  0x15   : > { %p37_p4 = scmp.ge.s32.totalorder %s3619_s23, 2  ;;  %p3549_p5 = scmp.eq.s32.totalorder %s2899_s21, 0 }
  0x16   : > { %p2912_p6 = por %p92_p2, %p91_p1  ;;  %p1947_p7 = scmp.ge.s32.totalorder %s2781_s20, 1 }
  0x17   : > { %s3621_s23 = smov (%p37_p4, %s3619_s23), 0  ;;  %p2921_p8 = por %p3549_p5, %p97_p3 }
  0x18   : > { %s3574_s25 = scalar_select %p2912_p6, 1, 0 }
  0x19   : > { %3575 = sst [smem:[#allocation26_spill]] %s3621_s23  ;;  %p311_p9 = scmp.lt.s32.totalorder %s2781_s20, 5 }
  0x1a   : > { %s3576_s26 = scalar_select %p2921_p8, 1, 0 }
  0x1b   : > { %s81_s27 = ssub.s32 %s2777_s19, %s3621_s23  ;;  %p2928_p11 = pnand %p1947_p7, %p311_p9 }
  0x1c   : > { %p82_p10 = scmp.eq.s32.totalorder %s81_s27, 0  ;;  %s2783_s30 = smov [#allocation2]  }
  0x1d   : > { %s3577_s28 = scalar_select %p2928_p11, 1, 0 }
  0x1e   : > { %s2933_s29 = scalar_select %p82_p10, %s2761_s15, %s84_s24  }
  0x1f   : > { %p2228_p12 = pneg %p2928_p11  ;;  %s323_s11 = sshll.u32 %s2783_s30, 4  ;;  %s324_s11 = int_to_ptr.vmem [resolvable:$true] %s323_s11 }
  0x20   : > { %3578 = sst [smem:[#allocation27_spill]] %s2933_s29  ;;  %s348_s13 = sand.u32 1, %s2781_s20  }
  0x21   : > { %p2939_p13 = pnand %p2228_p12, %p3549_p5  ;;  %s3580_s0 = sld [smem:[#allocation28_spill]] }
  0x23   : > { %s3579_s12 = scalar_select %p2939_p13, 1, 0 }
  0x24   : > { %p3553_p2 = pneg %p2939_p13 }
  0x27   : > { %s2381_s22 = scalar_lea.hbm %s3580_s0, 256 }
  0x28   : > { %p2382_p1 = scmp.ne.s32.totalorder %s3580_s0, %s2381_s22  ;;  %p2388_p7 = scmp.lt.u32.totalorder %s2381_s22, %s3580_s0 }
  0x2a   : > { %p2384_p3 = pnand %p3553_p2, %p2382_p1 }
  0x2c   : > { %p2385_p4 = pneg %p2384_p3 }
  0x2e   : > { %p2390_p9 = pnand %p2388_p7, %p2385_p4 }
  0x30   : > { %2393 = shalt.err (!%p2390_p9)
}
  0x31   : > { %s2394_s10 = scalar_lea.vmem %s324_s11, 256  ;;  %p2402_p0 = scmp.lt.s32.totalorder %s324_s11, %s324_s11 }
  0x32   : > { %p2395_p10 = scmp.ne.s32.totalorder %s324_s11, %s2394_s10  ;;  %p2403_p8 = scmp.lt.s32.totalorder %s2394_s10, %s2394_s10 }
  0x34   : > { %p2397_p12 = pnand %p2395_p10, %p3553_p2  ;;  %p2404_p11 = por %p2403_p8, %p2402_p0 }
  0x36   : > { %p2398_p5 = pneg %p2397_p12 }
  0x38   : > { %p2405_p6 = pnand %p2404_p11, %p2398_p5 }
  0x3a   : > { %2408 = shalt.err (!%p2405_p6)
}
  0x3b   : > { %s2784_s18 = smov 128   ;;  %s2785_s22 = smov 8  }
  0x3c   : > { %2231 = dma.hbm_to_vmem [thread:$0]  (!%p2939_p13), %s3580_s0, 256, %s324_s11, [#allocation3], %s2784_s18, %s2784_s18, %s2785_s22  }
  0x3d   : > { %p3581_p1 = scmp.ne.s32.totalorder %s3574_s25, 0  ;;  %p3582_p3 = scmp.lt.s32.totalorder %s2781_s20, 4 }
  0x3e   : > { %s2976_s10 = sand.u32 1, %s2761_s15   ;;  %s2982_s30 = sshll.u32 %s2777_s19, 8 }
  0x3f   : > { %p2971_p4 = pnand %p3582_p3, %p3581_p1  ;;  %s2979_s24 = sshll.u32 %s2976_s10, 4 }
  0x40   : > { %s3584_s2 = sld [smem:[#allocation29_spill]]  ;;  %s352_s25 = scalar_lea.vmem [#allocation7], %s2979_s24 }
  0x41   : > { %s3583_s27 = scalar_select %p2971_p4, 1, 0 }
  0x42   : > { %s359_s18 = sshll.u32 %s352_s25, 4  ;;  %s2993_s22 = scalar_lea.sflag [#allocation3], %s348_s13  ;;  %s2991_s18 = int_to_ptr.vmem [resolvable:$true] %s359_s18 }
  0x43   : > { %p2999_p6 = pneg %p2971_p4 }
  0x45   : > { %s3585_s29 = scalar_select %p2999_p6, 1, 0 }
  0x46   : > { %s2988_s11 = scalar_lea.hbm %s3584_s2, %s2982_s30  ;;  %s2414_s0 = scalar_lea.hbm %s3584_s2, 512 }
  0x47   : > { %s2409_s23 = scalar_lea.hbm %s2988_s11, 256  ;;  %p2415_p0 = scmp.lt.u32.totalorder %s2988_s11, %s3584_s2 }
  0x48   : > { %p2410_p5 = scmp.ne.s32.totalorder %s2988_s11, %s2409_s23  ;;  %p2416_p7 = scmp.lt.u32.totalorder %s2414_s0, %s2409_s23 }
  0x49   : > { %p2418_p10 = scmp.lt.u32.totalorder %s2409_s23, %s2988_s11 }
  0x4a   : > { %p2412_p8 = pnand %p2999_p6, %p2410_p5  ;;  %p2417_p9 = por %p2416_p7, %p2415_p0 }
  0x4c   : > { %p2413_p11 = pneg %p2412_p8  ;;  %p2419_p12 = por %p2418_p10, %p2417_p9 }
  0x4e   : > { %p2420_p1 = pnand %p2419_p12, %p2413_p11 }
  0x50   : > { %2423 = shalt.err (!%p2420_p1)
}
  0x51   : > { %s2424_s13 = scalar_lea.vmem %s2991_s18, 256  ;;  %s2786_s16 = smov [#allocation7]  }
  0x52   : > { %p2425_p3 = scmp.ne.s32.totalorder %s2991_s18, %s2424_s13  ;;  %s2429_s17 = sshll.u32 %s2786_s16, 4  ;;  %s2430_s17 = int_to_ptr.vmem [resolvable:$false] %s2429_s17 }
  0x53   : > { %s2431_s15 = scalar_lea.vmem %s2430_s17, 512  ;;  %p2432_p2 = scmp.lt.s32.totalorder %s2991_s18, %s2430_s17 }
  0x54   : > { %p2427_p5 = pnand %p2425_p3, %p2999_p6  ;;  %p2433_p13 = scmp.lt.s32.totalorder %s2431_s15, %s2424_s13 }
  0x56   : > { %p2428_p8 = pneg %p2427_p5  ;;  %p2434_p0 = por %p2433_p13, %p2432_p2 }
  0x58   : > { %p2435_p7 = pnand %p2434_p0, %p2428_p8 }
  0x5a   : > { %2438 = shalt.err (!%p2435_p7)
}
  0x5b   : > { %s2787_s0 = smov 64   ;;  %s2788_s23 = smov 4  }
  0x5c   : > { %2238 = dma.hbm_to_vmem [thread:$0]  (!%p2971_p4), %s2988_s11, 256, %s2991_s18, %s2993_s22, %s2787_s0, %s2787_s0, %s2788_s23  }
  0x5d   : > { %s3586_s3 = sld [smem:[#allocation30_spill]]  ;;  %s373_s17 = scalar_lea.vmem [#allocation8], %s2979_s24 }
  0x5e   : > { %s380_s15 = sshll.u32 %s373_s17, 4  ;;  %s3033_s15 = int_to_ptr.vmem [resolvable:$true] %s380_s15 }
  0x63   : > { %s3030_s13 = scalar_lea.hbm %s3586_s3, %s2982_s30  ;;  %s2444_s18 = scalar_lea.hbm %s3586_s3, 512 }
  0x64   : > { %s2439_s2 = scalar_lea.hbm %s3030_s13, 256  ;;  %p2445_p9 = scmp.lt.u32.totalorder %s3030_s13, %s3586_s3 }
  0x65   : > { %p2440_p13 = scmp.ne.s32.totalorder %s3030_s13, %s2439_s2  ;;  %p2446_p10 = scmp.lt.u32.totalorder %s2444_s18, %s2439_s2 }
  0x66   : > { %p2448_p1 = scmp.lt.u32.totalorder %s2439_s2, %s3030_s13 }
  0x67   : > { %p2442_p2 = pnand %p2440_p13, %p2999_p6  ;;  %p2447_p12 = por %p2446_p10, %p2445_p9 }
  0x69   : > { %p2443_p11 = pneg %p2442_p2  ;;  %p2449_p3 = por %p2448_p1, %p2447_p12 }
  0x6b   : > { %p2450_p5 = pnand %p2449_p3, %p2443_p11 }
  0x6d   : > { %2453 = shalt.err (!%p2450_p5)
}
  0x6e   : > { %s2454_s17 = scalar_lea.vmem %s3033_s15, 256  ;;  %s2789_s20 = smov [#allocation8]  }
  0x6f   : > { %p2455_p8 = scmp.ne.s32.totalorder %s3033_s15, %s2454_s17  ;;  %s2459_s11 = sshll.u32 %s2789_s20, 4  ;;  %s2460_s11 = int_to_ptr.vmem [resolvable:$false] %s2459_s11 }
  0x70   : > { %s2461_s25 = scalar_lea.vmem %s2460_s11, 512  ;;  %p2462_p13 = scmp.lt.s32.totalorder %s3033_s15, %s2460_s11 }
  0x71   : > { %p2457_p0 = pnand %p2455_p8, %p2999_p6  ;;  %p2463_p2 = scmp.lt.s32.totalorder %s2461_s25, %s2454_s17 }
  0x73   : > { %p2458_p7 = pneg %p2457_p0  ;;  %p2464_p9 = por %p2463_p2, %p2462_p13 }
  0x75   : > { %p2465_p10 = pnand %p2464_p9, %p2458_p7 }
  0x77   : > { %2468 = shalt.err (!%p2465_p10)
}
  0x78   : > { %2241 = dma.hbm_to_vmem [thread:$0]  (!%p2971_p4), %s3030_s13, 256, %s3033_s15, %s2993_s22, %s2787_s0, %s2787_s0, %s2788_s23  }
  0x79   : > { %s3587_s4 = sld [smem:[#allocation31_spill]]  ;;  %s394_s17 = scalar_lea.vmem [#allocation9], %s2979_s24 }
  0x7a   : > { %s401_s20 = sshll.u32 %s394_s17, 4  ;;  %s3067_s20 = int_to_ptr.vmem [resolvable:$true] %s401_s20 }
  0x7f   : > { %s3064_s16 = scalar_lea.hbm %s3587_s4, %s2982_s30  ;;  %s2474_s15 = scalar_lea.hbm %s3587_s4, 512 }
  0x80   : > { %s2469_s11 = scalar_lea.hbm %s3064_s16, 256  ;;  %p2475_p3 = scmp.lt.u32.totalorder %s3064_s16, %s3587_s4 }
  0x81   : > { %p2470_p11 = scmp.ne.s32.totalorder %s3064_s16, %s2469_s11  ;;  %p2476_p5 = scmp.lt.u32.totalorder %s2474_s15, %s2469_s11 }
  0x82   : > { %p2478_p0 = scmp.lt.u32.totalorder %s2469_s11, %s3064_s16 }
  0x83   : > { %p2472_p12 = pnand %p2470_p11, %p2999_p6  ;;  %p2477_p8 = por %p2476_p5, %p2475_p3 }
  0x85   : > { %p2473_p1 = pneg %p2472_p12  ;;  %p2479_p7 = por %p2478_p0, %p2477_p8 }
  0x87   : > { %p2480_p13 = pnand %p2479_p7, %p2473_p1 }
  0x89   : > { %2483 = shalt.err (!%p2480_p13)
}
  0x8a   : > { %s2484_s17 = scalar_lea.vmem %s3067_s20, 256  ;;  %s2790_s25 = smov [#allocation9]  }
  0x8b   : > { %p2485_p2 = scmp.ne.s32.totalorder %s3067_s20, %s2484_s17  ;;  %s2489_s13 = sshll.u32 %s2790_s25, 4  ;;  %s2490_s13 = int_to_ptr.vmem [resolvable:$false] %s2489_s13 }
  0x8c   : > { %s2491_s2 = scalar_lea.vmem %s2490_s13, 512  ;;  %p2492_p11 = scmp.lt.s32.totalorder %s3067_s20, %s2490_s13 }
  0x8d   : > { %p2487_p9 = pnand %p2485_p2, %p2999_p6  ;;  %p2493_p12 = scmp.lt.s32.totalorder %s2491_s2, %s2484_s17 }
  0x8f   : > { %p2488_p10 = pneg %p2487_p9  ;;  %p2494_p3 = por %p2493_p12, %p2492_p11 }
  0x91   : > { %p2495_p5 = pnand %p2494_p3, %p2488_p10 }
  0x93   : > { %2498 = shalt.err (!%p2495_p5)
}
  0x94   : > { %2244 = dma.hbm_to_vmem [thread:$0]  (!%p2971_p4), %s3064_s16, 256, %s3067_s20, %s2993_s22, %s2787_s0, %s2787_s0, %s2788_s23  }
  0x95   : > { %s3588_s5 = sld [smem:[#allocation32_spill]]  ;;  %s415_s17 = scalar_lea.vmem [#allocation10], %s2979_s24 }
  0x96   : > { %s422_s25 = sshll.u32 %s415_s17, 4  ;;  %s3101_s25 = int_to_ptr.vmem [resolvable:$true] %s422_s25 }
  0x9b   : > { %s3098_s18 = scalar_lea.hbm %s3588_s5, %s2982_s30  ;;  %s2504_s20 = scalar_lea.hbm %s3588_s5, 512 }
  0x9c   : > { %s2499_s13 = scalar_lea.hbm %s3098_s18, 256  ;;  %p2505_p7 = scmp.lt.u32.totalorder %s3098_s18, %s3588_s5 }
  0x9d   : > { %p2500_p1 = scmp.ne.s32.totalorder %s3098_s18, %s2499_s13  ;;  %p2506_p13 = scmp.lt.u32.totalorder %s2504_s20, %s2499_s13 }
  0x9e   : > { %p2508_p9 = scmp.lt.u32.totalorder %s2499_s13, %s3098_s18 }
  0x9f   : > { %p2502_p8 = pnand %p2500_p1, %p2999_p6  ;;  %p2507_p2 = por %p2506_p13, %p2505_p7 }
  0xa1   : > { %p2503_p0 = pneg %p2502_p8  ;;  %p2509_p10 = por %p2508_p9, %p2507_p2 }
  0xa3   : > { %p2510_p11 = pnand %p2509_p10, %p2503_p0 }
  0xa5   : > { %2513 = shalt.err (!%p2510_p11)
}
  0xa6   : > { %s2514_s17 = scalar_lea.vmem %s3101_s25, 256  ;;  %s2791_s2 = smov [#allocation10]  }
  0xa7   : > { %p2515_p12 = scmp.ne.s32.totalorder %s3101_s25, %s2514_s17  ;;  %s2519_s16 = sshll.u32 %s2791_s2, 4  ;;  %s2520_s16 = int_to_ptr.vmem [resolvable:$false] %s2519_s16 }
  0xa8   : > { %s2521_s11 = scalar_lea.vmem %s2520_s16, 512  ;;  %p2522_p1 = scmp.lt.s32.totalorder %s3101_s25, %s2520_s16 }
  0xa9   : > { %p2517_p3 = pnand %p2515_p12, %p2999_p6  ;;  %p2523_p8 = scmp.lt.s32.totalorder %s2521_s11, %s2514_s17 }
  0xab   : > { %p2518_p5 = pneg %p2517_p3  ;;  %p2524_p7 = por %p2523_p8, %p2522_p1 }
  0xad   : > { %p2525_p13 = pnand %p2524_p7, %p2518_p5 }
  0xaf   : > { %2528 = shalt.err (!%p2525_p13)
}
  0xb0   : > { %2247 = dma.hbm_to_vmem [thread:$0]  (!%p2971_p4), %s3098_s18, 256, %s3101_s25, %s2993_s22, %s2787_s0, %s2787_s0, %s2788_s23  }
  0xb1   : > { %s3132_s15 = scalar_lea.hbm %s3541_s6, %s2982_s30  ;;  %s436_s17 = scalar_lea.vmem [#allocation11], %s2979_s24 }
  0xb2   : > { %s443_s2 = sshll.u32 %s436_s17, 4  ;;  %s2529_s16 = scalar_lea.hbm %s3132_s15, 256  ;;  %s3135_s2 = int_to_ptr.vmem [resolvable:$true] %s443_s2 }
  0xb3   : > { %p2530_p0 = scmp.ne.s32.totalorder %s3132_s15, %s2529_s16  ;;  %s2534_s25 = scalar_lea.hbm %s3541_s6, 512 }
  0xb4   : > { %p2535_p10 = scmp.lt.u32.totalorder %s3132_s15, %s3541_s6  ;;  %p2536_p11 = scmp.lt.u32.totalorder %s2534_s25, %s2529_s16 }
  0xb5   : > { %p2532_p2 = pnand %p2530_p0, %p2999_p6  ;;  %p2538_p3 = scmp.lt.u32.totalorder %s2529_s16, %s3132_s15 }
  0xb6   : > { %p2537_p12 = por %p2536_p11, %p2535_p10 }
  0xb7   : > { %p2533_p9 = pneg %p2532_p2 }
  0xb8   : > { %p2539_p5 = por %p2538_p3, %p2537_p12 }
  0xba   : > { %p2540_p1 = pnand %p2539_p5, %p2533_p9 }
  0xbc   : > { %2543 = shalt.err (!%p2540_p1)
}
  0xbd   : > { %s2544_s24 = scalar_lea.vmem %s3135_s2, 256  ;;  %s2792_s20 = smov [#allocation11]  }
  0xbe   : > { %p2545_p8 = scmp.ne.s32.totalorder %s3135_s2, %s2544_s24  ;;  %s2549_s17 = sshll.u32 %s2792_s20, 4  ;;  %s2550_s17 = int_to_ptr.vmem [resolvable:$false] %s2549_s17 }
  0xbf   : > { %s2551_s11 = scalar_lea.vmem %s2550_s17, 512  ;;  %p2552_p0 = scmp.lt.s32.totalorder %s3135_s2, %s2550_s17 }
  0xc0   : > { %p2547_p7 = pnand %p2545_p8, %p2999_p6  ;;  %p2553_p2 = scmp.lt.s32.totalorder %s2551_s11, %s2544_s24 }
  0xc2   : > { %p2548_p13 = pneg %p2547_p7  ;;  %p2554_p10 = por %p2553_p2, %p2552_p0 }
  0xc4   : > { %p2555_p11 = pnand %p2554_p10, %p2548_p13 }
  0xc6   : > { %2558 = shalt.err (!%p2555_p11)
}
  0xc7   : > { %2250 = dma.hbm_to_vmem [thread:$0]  (!%p2971_p4), %s3132_s15, 256, %s3135_s2, %s2993_s22, %s2787_s0, %s2787_s0, %s2788_s23  }
  0xc8   : > { %s1966_s16 = sshll.u32 %s2777_s19, 4  ;;  %s456_s18 = scalar_lea.vmem [#allocation12], %s2976_s10 }
  0xc9   : > { %s463_s25 = sshll.u32 %s456_s18, 4  ;;  %s461_s24 = scalar_lea.hbm %s3542_s7, %s1966_s16  ;;  %s464_s25 = int_to_ptr.vmem [resolvable:$true] %s463_s25 }
  0xca   : > { %s2559_s20 = scalar_lea.hbm %s461_s24, 16  ;;  %s2564_s3 = scalar_lea.hbm %s3542_s7, 32 }
  0xcb   : > { %p2560_p9 = scmp.ne.s32.totalorder %s461_s24, %s2559_s20  ;;  %p2565_p5 = scmp.lt.u32.totalorder %s461_s24, %s3542_s7 }
  0xcc   : > { %p2566_p1 = scmp.lt.u32.totalorder %s2564_s3, %s2559_s20  ;;  %p2568_p7 = scmp.lt.u32.totalorder %s2559_s20, %s461_s24 }
  0xcd   : > { %p2562_p12 = pnand %p2560_p9, %p2999_p6 }
  0xce   : > { %p2567_p8 = por %p2566_p1, %p2565_p5 }
  0xcf   : > { %p2563_p3 = pneg %p2562_p12 }
  0xd0   : > { %p2569_p13 = por %p2568_p7, %p2567_p8 }
  0xd2   : > { %p2570_p0 = pnand %p2569_p13, %p2563_p3 }
  0xd4   : > { %2573 = shalt.err (!%p2570_p0)
}
  0xd5   : > { %s2574_s15 = scalar_lea.vmem %s464_s25, 16  ;;  %s2793_s2 = smov [#allocation12]  }
  0xd6   : > { %p2575_p2 = scmp.ne.s32.totalorder %s464_s25, %s2574_s15  ;;  %s2579_s16 = sshll.u32 %s2793_s2, 4  ;;  %s2580_s16 = int_to_ptr.vmem [resolvable:$false] %s2579_s16 }
  0xd7   : > { %s2581_s18 = scalar_lea.vmem %s2580_s16, 32  ;;  %p2582_p9 = scmp.lt.s32.totalorder %s464_s25, %s2580_s16 }
  0xd8   : > { %p2577_p10 = pnand %p2575_p2, %p2999_p6  ;;  %p2583_p12 = scmp.lt.s32.totalorder %s2581_s18, %s2574_s15 }
  0xda   : > { %p2578_p11 = pneg %p2577_p10  ;;  %p2584_p4 = por %p2583_p12, %p2582_p9 }
  0xdc   : > { %p2585_p1 = pnand %p2584_p4, %p2578_p11 }
  0xde   : > { %2588 = shalt.err (!%p2585_p1)
}
  0xdf   : > { %p3589_p5 = scmp.ne.s32.totalorder %s3583_s27, 0  ;;  %s1967_s3 = sshll.u32 %s2976_s10, 6 }
  0xe0   : > { %s2030_s4 = sshll.u32 %s2777_s19, 10  ;;  %s474_s20 = scalar_lea.vmem [#allocation13], %s1967_s3 }
  0xe1   : > { %2253 = dma.hbm_to_vmem [thread:$0]  (!%p3589_p5), %s461_s24, 16, %s464_s25, %s2993_s22  }
  0xe2   : > { %s3185_s30 = scalar_lea.hbm %s3543_s8, %s2030_s4  ;;  %s481_s17 = sshll.u32 %s474_s20, 4  ;;  %s3187_s17 = int_to_ptr.vmem [resolvable:$true] %s481_s17 }
  0xe3   : > { %s2794_s11 = smov [#allocation5]   ;;  %s2589_s2 = scalar_lea.hbm %s3185_s30, 1024 }
  0xe4   : > { %s3189_s15 = sshll.u32 %s2794_s11, 4  ;;  %p2590_p4 = scmp.ne.s32.totalorder %s3185_s30, %s2589_s2  ;;  %s338_s15 = int_to_ptr.vmem [resolvable:$true] %s3189_s15 }
  0xe5   : > { %s2594_s16 = scalar_lea.hbm %s3543_s8, 2048  ;;  %p2595_p7 = scmp.lt.u32.totalorder %s3185_s30, %s3543_s8 }
  0xe6   : > { %p2592_p3 = pnand %p2590_p4, %p2999_p6  ;;  %p2596_p13 = scmp.lt.u32.totalorder %s2594_s16, %s2589_s2 }
  0xe7   : > { %p2598_p2 = scmp.lt.u32.totalorder %s2589_s2, %s3185_s30 }
  0xe8   : > { %p2593_p8 = pneg %p2592_p3  ;;  %p2597_p0 = por %p2596_p13, %p2595_p7 }
  0xea   : > { %p2599_p10 = por %p2598_p2, %p2597_p0 }
  0xec   : > { %p2600_p11 = pnand %p2599_p10, %p2593_p8 }
  0xee   : > { %2603 = shalt.err (!%p2600_p11)
}
  0xef   : > { %s2604_s3 = scalar_lea.vmem %s3187_s17, 1024  ;;  %s2795_s5 = smov [#allocation13]  }
  0xf0   : > { %p2605_p9 = scmp.ne.s32.totalorder %s3187_s17, %s2604_s3  ;;  %s2609_s13 = sshll.u32 %s2795_s5, 4  ;;  %s2610_s13 = int_to_ptr.vmem [resolvable:$false] %s2609_s13 }
  0xf1   : > { %s2611_s20 = scalar_lea.vmem %s2610_s13, 2048  ;;  %p2612_p4 = scmp.lt.s32.totalorder %s3187_s17, %s2610_s13 }
  0xf2   : > { %p2607_p12 = pnand %p2605_p9, %p2999_p6  ;;  %p2613_p3 = scmp.lt.s32.totalorder %s2611_s20, %s2604_s3 }
  0xf4   : > { %p2608_p1 = pneg %p2607_p12  ;;  %p2614_p7 = por %p2613_p3, %p2612_p4 }
  0xf6   : > { %p2615_p13 = pnand %p2614_p7, %p2608_p1 }
  0xf8   : > { %2618 = shalt.err (!%p2615_p13)
}
  0xf9   : > { %2256 = dma.hbm_to_vmem [thread:$0]  (!%p3589_p5), %s3185_s30, 1024, %s3187_s17, %s2993_s22, %s2787_s0, %s2787_s0, %s2788_s23  }
  0xfa   : > { %s1970_s11 = sshll.u32 %s2976_s10, 3  ;;  %s2619_s24 = scalar_lea.hbm %s3536_s1, 128 }
  0xfb   : > { %p2620_p8 = scmp.ne.s32.totalorder %s3536_s1, %s2619_s24  ;;  %p3590_p0 = scmp.ne.s32.totalorder %s3579_s12, 0 }
  0xfc   : > { %p2626_p9 = scmp.lt.u32.totalorder %s2619_s24, %s3536_s1 }
  0xfd   : > { %p3591_p2 = pneg %p3590_p0 }
  0xff   : > { %p2622_p10 = pnand %p2620_p8, %p3591_p2 }
 0x101   : > { %p2623_p11 = pneg %p2622_p10 }
 0x103   : > { %p2628_p12 = pnand %p2626_p9, %p2623_p11 }
 0x105   : > { %2631 = shalt.err (!%p2628_p12)
}
 0x106   : > { %s2632_s0 = scalar_lea.vmem %s338_s15, 128  ;;  %p3592_p4 = pmov %p3591_p2 }
 0x107   : > { %p2633_p1 = scmp.ne.s32.totalorder %s338_s15, %s2632_s0  ;;  %p2640_p13 = scmp.lt.s32.totalorder %s338_s15, %s338_s15 }
 0x108   : > { %p2641_p5 = scmp.lt.s32.totalorder %s2632_s0, %s2632_s0 }
 0x109   : > { %p2635_p3 = pnand %p2633_p1, %p3592_p4 }
 0x10a   : > { %p2642_p6 = por %p2641_p5, %p2640_p13 }
 0x10b   : > { %p2636_p7 = pneg %p2635_p3 }
 0x10d   : > { %p2643_p2 = pnand %p2642_p6, %p2636_p7 }
 0x10f   : > { %2646 = shalt.err (!%p2643_p2)
}
 0x110   : > { %2234 = dma.hbm_to_vmem [thread:$0]  (!%p3590_p0), %s3536_s1, 128, %s338_s15, [#allocation6]  }
 0x111   : > { %s1971_s30 = sshll.u32 %s2777_s19, 7  ;;  %s495_s20 = scalar_lea.vmem [#allocation14], %s1970_s11 }
 0x112   : > { %s3242_s13 = scalar_lea.hbm %s3544_s9, %s1971_s30  ;;  %s502_s2 = sshll.u32 %s495_s20, 4  ;;  %s503_s2 = int_to_ptr.vmem [resolvable:$true] %s502_s2 }
 0x113   : > { %s2647_s12 = scalar_lea.hbm %s3242_s13, 128  ;;  %p3593_p5 = scmp.ne.s32.totalorder %s3585_s29, 0 }
 0x114   : > { %p2648_p6 = scmp.ne.s32.totalorder %s3242_s13, %s2647_s12  ;;  %s2652_s24 = scalar_lea.hbm %s3544_s9, 256 }
 0x115   : > { %p2653_p0 = scmp.lt.u32.totalorder %s3242_s13, %s3544_s9  ;;  %p2654_p11 = scmp.lt.u32.totalorder %s2652_s24, %s2647_s12 }
 0x116   : > { %p2650_p8 = pnand %p2648_p6, %p3593_p5  ;;  %p2656_p12 = scmp.lt.u32.totalorder %s2647_s12, %s3242_s13 }
 0x117   : > { %p2655_p9 = por %p2654_p11, %p2653_p0 }
 0x118   : > { %p2651_p10 = pneg %p2650_p8 }
 0x119   : > { %p2657_p1 = por %p2656_p12, %p2655_p9 }
 0x11b   : > { %p2658_p4 = pnand %p2657_p1, %p2651_p10 }
 0x11d   : > { %2661 = shalt.err (!%p2658_p4)
}
 0x11e   : > { %s2662_s11 = scalar_lea.vmem %s503_s2, 128  ;;  %s2796_s4 = smov [#allocation14]  }
 0x11f   : > { %p2663_p3 = scmp.ne.s32.totalorder %s503_s2, %s2662_s11  ;;  %s2667_s3 = sshll.u32 %s2796_s4, 4  ;;  %s2668_s3 = int_to_ptr.vmem [resolvable:$false] %s2667_s3 }
 0x120   : > { %s2669_s0 = scalar_lea.vmem %s2668_s3, 256  ;;  %p2670_p2 = scmp.lt.s32.totalorder %s503_s2, %s2668_s3 }
 0x121   : > { %p2665_p7 = pnand %p2663_p3, %p3593_p5  ;;  %p2671_p6 = scmp.lt.s32.totalorder %s2669_s0, %s2662_s11 }
 0x123   : > { %p2666_p13 = pneg %p2665_p7  ;;  %p2672_p8 = por %p2671_p6, %p2670_p2 }
 0x125   : > { %p2673_p0 = pnand %p2672_p8, %p2666_p13 }
 0x127   : > { %2676 = shalt.err (!%p2673_p0)
}
 0x128   : > { %p3594_p11 = scmp.ne.s32.totalorder %s3583_s27, 0  ;;  %p3595_p10 = scmp.ne.s32.totalorder %s3577_s28, 0 }
 0x129   : > { %p3596_p5 = scmp.eq.s32.totalorder (!%p3595_p10), %s2899_s21, 0 }
 0x12a   : > { %2259 = dma.hbm_to_vmem [thread:$0]  (!%p3594_p11), %s3242_s13, 128, %s503_s2, %s2993_s22  }
 0x12b   : > { %511 = sbr.rel (%p3595_p10) target bundleno = 4028 (0xfbc), region = 60 }
 0x132   : > { %2736 = dma.done.wait (%p3596_p5), [#allocation3], 256   ;;  %p3597_p9 = pmov %p3596_p5 }
 0x133   : > { %p3598_p12 = pmov %p3596_p5 }
 0x134   : > { %2738 = vsyncadd (%p3597_p9), [#allocation3], 4294967040 }
 0x135   : > { %2740 = dma.done.wait (%p3598_p12), [#allocation6], 128   ;;  %p3599_p1 = pmov %p3596_p5 }
 0x136   : > { %s521_s27 = sand.u32 1, %s2899_s21   ;;  %s3274_s22 = sand.u32 1, %s2757_s14  }
 0x137   : > { %2742 = vsyncadd (%p3599_p1), [#allocation6], 4294967168  ;;  %s3277_s28 = sshll.u32 %s3274_s22, 4  ;;  %s522_s29 = scalar_lea.sflag [#allocation3], %s521_s27 }
 0x138   : > { %s525_s10 = scalar_lea.vmem [#allocation7], %s3277_s28  ;;  %p3600_p4 = scmp.ne.s32.totalorder %s3576_s26, 0 }
 0x13a   : > { %2744 = dma.done.wait (%p3600_p4), %s522_s29, 2448  }
 0x13b   : > { %2746 = vsyncadd (%p3600_p4), %s522_s29, 4294964848  ;;  %s1980_s23 = sshll.u32 %s3274_s22, 6  ;;  %s1981_s30 = sshll.u32 %s3274_s22, 3 }
 0x13c   : > { %s534_s17 = scalar_lea.vmem [#allocation8], %s3277_s28  ;;  %s543_s5 = scalar_lea.vmem [#allocation9], %s3277_s28 }
 0x13d   : > { %s3289_s13 = scalar_lea.vmem [#allocation10], %s3277_s28  ;;  %s561_s20 = scalar_lea.vmem [#allocation11], %s3277_s28 }
 0x13e   : > { %s569_s2 = scalar_lea.vmem [#allocation12], %s3274_s22  ;;  %s3293_s12 = scalar_lea.vmem [#allocation13], %s1980_s23 }
 0x13f   : > { %s3295_s25 = scalar_lea.vmem [#allocation14], %s1981_s30  ;;  %s3601_s26 = sld [smem:[#allocation22_spill]] }
 0x145   : > { %p1982_p3 = scmp.ne.s32.totalorder %s3601_s26, 0 }
 0x146   : > { %s3602_s15 = sld [smem:[#allocation21_spill]] (!%p1982_p3)  ;;  %vm662_vm0 = vcmask (!%p1982_p3), 261120  }
 0x147   : > { %657 = sbr.rel (%p1982_p3) target bundleno = 336 (0x150), region = 104 }
 0x14c   : > { %s1983_s24 = sshll.u32 (!%p1982_p3), %s3602_s15, 3 }
 0x14d   : > { %s659_s16 = scalar_lea.vmem (!%p1982_p3), [#allocation2], %s1983_s24  ;;  %s661_s18 = scalar_lea.vmem (!%p1982_p3), [#allocation15], %s1983_s24 }
 0x14e   : > { %v660_v0 = vld [vmem:[%s659_s16] sm:$0xff] }
 0x14f   : > { %663 = vst.msk [vmem:[%s661_s18] sm:$0xff] %vm662_vm0, %v660_v0 }
 0x150 PF: > { %v2345_v1 = vld [vmem:[%s525_s10] sm:$0xff]   ;;  %s3603_s11 = sld [smem:[#allocation21_spill]]  ;;  %v2797_v2 = vmov 0.0   ;;  %v2346_v3 = vld [vmem:[%s525_s10 + $0x8] sm:$0xff]   ;;  %vm2798_vm1 = vmmov 0   ;;  %vm685_vm2 = vcmask 261120  }
 0x151   : > { %2076 = vmatprep.subr.bf16.mxu1 %v2797_v2  ;;  %2106 = vmatprep.subr.bf16.mxu0 %v2797_v2  ;;  %v2347_v6 = vld [vmem:[%s534_s17] sm:$0xff]   ;;  %v2348_v7 = vld [vmem:[%s534_s17 + $0x8] sm:$0xff]   ;;  %vm845_vm3 = vcmask 64512   ;;  %s2799_s0 = smov 120   ;;  %vm907_vm4 = vcmask 1043456   ;;  %s2800_s27 = smov 112  }
 0x152   : > { %2077 = vmatpush3.bf16.msra.mxu1 %v2345_v1  ;;  %2080 = vmatprep.mubr.msk.bf16.mxu1 %vm2798_vm1, %v2797_v2  ;;  %v2349_v8 = vld [vmem:[%s543_s5] sm:$0xff]   ;;  %v2350_v9 = vld [vmem:[%s543_s5 + $0x8] sm:$0xff]   ;;  %s2801_s29 = smov 104   ;;  %s2802_s22 = smov [#allocation15]  }
 0x153   : > { %2078 = vmatprep.subr.bf16.mxu1 %v2797_v2  ;;  %2108 = vmatprep.mubr.msk.bf16.mxu0 %vm2798_vm1, %v2797_v2  ;;  %v3361_v30 = vld [vmem:[#allocation5] sm:$0xff]  ;;  %v1998_v57 = vld [vmem:[%s3289_s13 + $0x4] sm:$0xf]  ;;  %v952_v63 = vld [vmem:[%s3289_s13] sm:$0xf]  ;;  %s1719_s28 = sshll.u32 %s2802_s22, 4  ;;  %s1720_s28 = int_to_ptr.vmem [resolvable:$true] %s1719_s28 }
 0x154   : > { %v1073_v58 = vsel %vm907_vm4, %v1998_v57, 0  ;;  %p2265_p7 = scmp.eq.s32.totalorder %s2899_s21, 3  ;;  %s2677_s10 = scalar_lea.vmem %s1720_s28, 256 }
 0x155   : > { %p2678_p13 = scmp.ne.s32.totalorder %s1720_s28, %s2677_s10  ;;  %p2684_p8 = scmp.lt.s32.totalorder %s1720_s28, %s1720_s28 }
 0x156   : > { %s1984_s4 = sshll.u32 %s3603_s11, 3  ;;  %2079 = vmatpush3.bf16.msra.mxu1 %v2346_v3  ;;  %v1119_v3 = vsel %vm907_vm4, %v952_v63, 0  ;;  %p2685_p0 = scmp.lt.s32.totalorder %s2677_s10, %s2677_s10 }
 0x157   : > { %s3307_s3 = scalar_lea.vmem [#allocation15], %s1984_s4  ;;  %2084 = vmatprep.subr.bf16.mxu1 %v2797_v2  ;;  %p2679_p2 = pnand %p2678_p13, %p2265_p7 }
 0x158   : > { %v3310_v4 = vld [vmem:[%s3307_s3] sm:$0xff]  ;;  %p2686_p11 = por %p2685_p0, %p2684_p8 }
 0x159   : > { %v667_v5 = vpack.c.bf16 %v3310_v4, %v3310_v4  ;;  %p2680_p6 = pneg %p2679_p2 }
 0x15b   : > { %2081 = vmatmul.mubr.msk.bf16.vlgmr.msra.gmra.mrb[0].mxu1 %vm685_vm2, %v667_v5  ;;  %p2687_p10 = pnand %p2686_p11, %p2680_p6 }
 0x15c   : > { %2085 = vmatpush3.bf16.msra.mxu1 %v2347_v6  ;;  %2088 = vmatprep.mubr.msk.bf16.mxu1 %vm2798_vm1, %v2797_v2 }
 0x15d   : > { %2086 = vmatprep.subr.bf16.mxu1 %v2797_v2 }
 0x160   : > { %2087 = vmatpush3.bf16.msra.mxu1 %v2348_v7 }
 0x161   : > { %2092 = vmatprep.subr.bf16.mxu1 %v2797_v2 }
 0x163   : > { %2089 = vmatmul.mubr.msk.bf16.vlgmr.msra.gmra.mrb[4].mxu1 %vm685_vm2, %v667_v5 }
 0x164   : > { %2093 = vmatpush3.bf16.msra.mxu1 %v2349_v8  ;;  %2096 = vmatprep.mubr.msk.bf16.mxu1 %vm2798_vm1, %v2797_v2 }
 0x165   : > { %2094 = vmatprep.subr.bf16.mxu1 %v2797_v2 }
 0x168   : > { %2095 = vmatpush3.bf16.msra.mxu1 %v2350_v9 }
 0x169   : > { %2100 = vmatprep.subr.bf16.mxu1 %v2797_v2 }
 0x16b   : > { %2097 = vmatmul.mubr.msk.bf16.vlgmr.msra.gmra.mrb[8].mxu1 %vm685_vm2, %v667_v5 }
 0x16c   : > { %2102 = vmatprep.mubr.msk.bf16.mxu1 %vm2798_vm1, %v2797_v2 }
 0x22e   : > { %v723_v10 = vpop.f32.mrb[0].mxu1 }
 0x22f   : > { %v2082_v11 = vpop.f32.mrb[1].mxu1  ;;  %v3342_v20 = vpack.c.bf16 %v723_v10, %v723_v10 }
 0x230   : > { %v726_v12 = vpop.f32.mrb[2].mxu1 }
 0x231   : > { %v2083_v13 = vpop.f32.mrb[3].mxu1 }
 0x236   : > { %v780_v14 = vpop.f32.mrb[4].mxu1 }
 0x237   : > { %v3336_v15 = vpack.c.bf16 %v780_v14, %v780_v14  ;;  %v2090_v16 = vpop.f32.mrb[5].mxu1 }
 0x238   : > { %v783_v17 = vpop.f32.mrb[6].mxu1 }
 0x239   : > { %957 = vrot.lane.b32.xlu0 %v3336_v15, %s2799_s0  ;;  %v2091_v18 = vpop.f32.mrb[7].mxu1  ;;  %v850_v19 = vsel %vm845_vm3, %v3336_v15, 0 }
 0x23a   : > { %2101 = vmatpush3.bf16.xpose.msra.mxu1 %v850_v19 }
 0x23b   : > { %2112 = vmatprep.subr.bf16.mxu1 %v2797_v2 }
 0x23d   : > { %954 = vrot.lane.b32.xlu0 %v3342_v20, %s2799_s0 }
 0x23e   : > { %v837_v21 = vpop.f32.mrb[8].mxu1 }
 0x23f   : > { %v2098_v22 = vpop.f32.mrb[9].mxu1  ;;  %v3351_v25 = vpack.c.bf16 %v837_v21, %v837_v21 }
 0x240   : > { %v840_v23 = vpop.f32.mrb[10].mxu1 }
 0x241   : > { %2103 = vmatmul.mubr.msk.bf16.vlgmr.msra.gmra.mrb[12].mxu1 %vm845_vm3, %v3342_v20  ;;  %v2099_v24 = vpop.f32.mrb[11].mxu1  ;;  %v909_v26 = vsel %vm907_vm4, %v3351_v25, 0 }
 0x242   : > { %2114 = vmatprep.mubr.msk.bf16.mxu1 %vm2798_vm1, %v2797_v2  ;;  %2107 = vmatpush3.bf16.msra.mxu0 %v909_v26 }
 0x243   : > { %2118 = vmatprep.subr.bf16.mxu0 %v2797_v2 }
 0x2ab   : > { %v958_v27 = vpop.permute.xlu0 %957 }
 0x2ac   : > { %v963_v28 = vsel %vm845_vm3, %v958_v27, 0 }
 0x2ad   : > { %2113 = vmatpush3.bf16.xpose.msra.mxu1 %v963_v28 }
 0x2ae   : > { %2124 = vmatprep.subr.bf16.mxu1 %v2797_v2 }
 0x2af   : > { %v955_v29 = vpop.permute.xlu0 %954 }
 0x2b4   : > { %2115 = vmatmul.mubr.msk.bf16.vlgmr.msra.gmra.mrb[16].mxu1 %vm845_vm3, %v955_v29 }
 0x2b5   : > { %2126 = vmatprep.mubr.msk.bf16.mxu1 %vm2798_vm1, %v2797_v2  ;;  %2125 = vmatpush3.bf16.msra.mxu1 %v1073_v58 }
 0x2b6   : > { %2136 = vmatprep.subr.bf16.mxu1 %v2797_v2 }
 0x314   : > { %v886_v31 = vpop.f32.mrb[12].mxu1 }
 0x315   : > { %v887_v32 = vadd.f32 %v886_v31, %v3361_v30  ;;  %v2104_v33 = vpop.f32.mrb[13].mxu1 }
 0x316   : > { %v889_v34 = vpop.f32.mrb[14].mxu1 }
 0x317   : > { %v2105_v35 = vpop.f32.mrb[15].mxu1  ;;  %v892_v36 = vsel %vm845_vm3, %v887_v32, -inf }
 0x318   : > { %893 = vmax.xlane.f32.xlu1 %v892_v36 }
 0x387   : > { %v999_v37 = vpop.f32.mrb[16].mxu1 }
 0x388   : > { %v1000_v38 = vadd.f32 %v999_v37, %v3361_v30  ;;  %v2116_v39 = vpop.f32.mrb[17].mxu1 }
 0x389   : > { %v1002_v40 = vpop.f32.mrb[18].mxu1 }
 0x38a   : > { %v2117_v41 = vpop.f32.mrb[19].mxu1  ;;  %v1005_v42 = vsel %vm845_vm3, %v1000_v38, -inf }
 0x38b   : > { %1006 = vmax.xlane.f32.xlu1 %v1005_v42 }
 0x3a5   : > { %v894_v43 = vpop.xlane.xlu1 %893 }
 0x3a6   : > { %v895_v44 = vsub.f32 %v887_v32, %v894_v43 }
 0x3a8   : > { %v896_v45 = vmul.f32 1.442695, %v895_v44 }
 0x3aa   : > { %2361 = vpow2.f32 %v896_v45 }
 0x3b4   : > { %v2362_v46 = vpop.eup %2361 }
 0x3b5   : > { %v898_v47 = vsel %vm845_vm3, %v2362_v46, 0.0 }
 0x3b6   : > { %899 = vadd.xlane.f32.xlu0 %v898_v47 }
 0x3cc   : > { %1223 = vrot.lane.b32.xlu0 %v3351_v25, %s2800_s27 }
 0x418   : > { %v1007_v48 = vpop.xlane.xlu1 %1006 }
 0x419   : > { %v1008_v49 = vsub.f32 %v1000_v38, %v1007_v48 }
 0x41b   : > { %v1009_v50 = vmul.f32 1.442695, %v1008_v49 }
 0x41d   : > { %2363 = vpow2.f32 %v1009_v50 }
 0x427   : > { %v2364_v51 = vpop.eup %2363 }
 0x428   : > { %v1011_v52 = vsel %vm845_vm3, %v2364_v51, 0.0 }
 0x429   : > { %1012 = vadd.xlane.f32.xlu1 %v1011_v52 }
 0x43a   : > { %1018 = vrot.lane.b32.xlu1 %v3351_v25, %s2799_s0 }
 0x43e   : > { %1163 = vrot.lane.b32.xlu1 %v3336_v15, %s2800_s27 }
 0x442   : > { %1161 = vrot.lane.b32.xlu1 %v3342_v20, %s2800_s27 }
 0x443   : > { %v900_v53 = vpop.xlane.xlu0 %899 }
 0x444   : > { %2365 = vrcp.f32 %v900_v53 }
 0x447   : > { %v1224_v5 = vpop.permute.xlu0 %1223 }
 0x448   : > { %v1229_v10 = vsel %vm907_vm4, %v1224_v5, 0  ;;  %v2007_v5 = vld [vmem:[%s3289_s13 + $0xc] sm:$0xf] }
 0x44e   : > { %v2366_v54 = vpop.eup %2365 }
 0x44f   : > { %v902_v55 = vmul.f32 %v2366_v54, %v2362_v46 }
 0x451   : > { %v903_v56 = vpack.c.bf16 %v902_v55, %v902_v55 }
 0x453   : > { %2109 = vmatmul.mubr.msk.bf16.vlgmr.msra.gmra.mrb[0].mxu0 %vm845_vm3, %v903_v56 }
 0x454   : > { %2120 = vmatprep.mubr.msk.bf16.mxu0 %vm2798_vm1, %v2797_v2 }
 0x4b6   : > { %v1013_v59 = vpop.xlane.xlu1 %1012 }
 0x4b7   : > { %2367 = vrcp.f32 %v1013_v59 }
 0x4ba   : > { %v1019_v60 = vpop.permute.xlu1 %1018 }
 0x4bb   : > { %v1024_v61 = vsel %vm907_vm4, %v1019_v60, 0 }
 0x4bc   : > { %2119 = vmatpush3.bf16.msra.mxu0 %v1024_v61 }
 0x4bd   : > { %2130 = vmatprep.subr.bf16.mxu0 %v2797_v2 }
 0x4be   : > { %v1164_v12 = vpop.permute.xlu1 %1163 }
 0x4bf   : > { %v1169_v18 = vsel %vm845_vm3, %v1164_v12, 0 }
 0x4c1   : > { %v2368_v62 = vpop.eup %2367 }
 0x4c2   : > { %v1015_v0 = vmul.f32 %v2368_v62, %v2364_v51  ;;  %v1162_v21 = vpop.permute.xlu1 %1161 }
 0x4c4   : > { %v1016_v1 = vpack.c.bf16 %v1015_v0, %v1015_v0 }
 0x4c6   : > { %2121 = vmatmul.mubr.msk.bf16.vlgmr.msra.gmra.mrb[4].mxu0 %vm845_vm3, %v1016_v1 }
 0x4c7   : > { %2131 = vmatpush3.bf16.msra.mxu0 %v1119_v3  ;;  %2132 = vmatprep.mubr.msk.bf16.mxu0 %vm2798_vm1, %v2797_v2 }
 0x4c8   : > { %2142 = vmatprep.subr.bf16.mxu0 %v2797_v2 }
 0x526   : > { %v945_v6 = vpop.f32.mrb[0].mxu0 }
 0x527   : > { %v951_v7 = vpack.c.bf16 %v945_v6, %v945_v6  ;;  %v2110_v8 = vpop.f32.mrb[1].mxu0 }
 0x528   : > { %v948_v9 = vpop.f32.mrb[2].mxu0 }
 0x529   : > { %v2111_v11 = vpop.f32.mrb[3].mxu0  ;;  %2133 = vmatmul.mubr.msk.bf16.vlgmr.msra.gmra.mrb[8].mxu0 %vm845_vm3, %v951_v7 }
 0x52a   : > { %2143 = vmatpush3.bf16.msra.mxu0 %v1229_v10  ;;  %2144 = vmatprep.mubr.msk.bf16.mxu0 %vm2798_vm1, %v2797_v2 }
 0x52b   : > { %2154 = vmatprep.subr.bf16.mxu0 %v2797_v2 }
 0x599   : > { %v1060_v13 = vpop.f32.mrb[4].mxu0 }
 0x59a   : > { %v1066_v14 = vpack.c.bf16 %v1060_v13, %v1060_v13  ;;  %v2122_v16 = vpop.f32.mrb[5].mxu0 }
 0x59b   : > { %v1063_v17 = vpop.f32.mrb[6].mxu0 }
 0x59c   : > { %v2123_v19 = vpop.f32.mrb[7].mxu0  ;;  %2127 = vmatmul.mubr.msk.bf16.vlgmr.msra.gmra.mrb[20].mxu1 %vm845_vm3, %v1066_v14 }
 0x59d   : > { %2137 = vmatpush3.bf16.xpose.msra.mxu1 %v1169_v18  ;;  %2138 = vmatprep.mubr.msk.bf16.mxu1 %vm2798_vm1, %v2797_v2 }
 0x59e   : > { %2148 = vmatprep.subr.bf16.mxu1 %v2797_v2 }
 0x5a4   : > { %2139 = vmatmul.mubr.msk.bf16.vlgmr.msra.gmra.mrb[24].mxu1 %vm845_vm3, %v1162_v21 }
 0x5a5   : > { %2150 = vmatprep.mubr.msk.bf16.mxu1 %vm2798_vm1, %v2797_v2 }
 0x5fc   : > { %v1155_v22 = vpop.f32.mrb[8].mxu0 }
 0x5fd   : > { %v2134_v23 = vpop.f32.mrb[9].mxu0 }
 0x5fe   : > { %v1158_v24 = vpop.f32.mrb[10].mxu0  ;;  %v1481_v23 = vlaneseq }
 0x5ff   : > { %v2135_v26 = vpop.f32.mrb[11].mxu0 }
 0x600   : > { %v3441_v24 = vshrl.u32 %v1481_v23, 7 }
 0x602   : > { %v1483_v26 = vsub.s32 0, %v3441_v24 }
 0x66f   : > { %v1109_v27 = vpop.f32.mrb[20].mxu1 }
 0x670   : > { %v3401_v28 = vadd.f32 %v1155_v22, %v1109_v27  ;;  %v2128_v29 = vpop.f32.mrb[21].mxu1  ;;  %v3445_v27 = vld [vmem:[%s3295_s25] sm:$0x3f] }
 0x671   : > { %v1112_v31 = vpop.f32.mrb[22].mxu1 }
 0x672   : > { %v2129_v32 = vpop.f32.mrb[23].mxu1 }
 0x677   : > { %v1205_v33 = vpop.f32.mrb[24].mxu1 }
 0x678   : > { %v1206_v34 = vadd.f32 %v1205_v33, %v3361_v30  ;;  %v2140_v35 = vpop.f32.mrb[25].mxu1 }
 0x679   : > { %v1208_v36 = vpop.f32.mrb[26].mxu1 }
 0x67a   : > { %v2141_v37 = vpop.f32.mrb[27].mxu1  ;;  %v1211_v38 = vsel %vm845_vm3, %v1206_v34, -inf }
 0x67b   : > { %1212 = vmax.xlane.f32.xlu1 %v1211_v38 }
 0x708   : > { %v1213_v39 = vpop.xlane.xlu1 %1212 }
 0x709   : > { %v1214_v40 = vsub.f32 %v1206_v34, %v1213_v39 }
 0x70b   : > { %v1215_v41 = vmul.f32 1.442695, %v1214_v40 }
 0x70d   : > { %2369 = vpow2.f32 %v1215_v41 }
 0x717   : > { %v2370_v42 = vpop.eup %2369 }
 0x718   : > { %v1217_v43 = vsel %vm845_vm3, %v2370_v42, 0.0 }
 0x719   : > { %1218 = vadd.xlane.f32.xlu0 %v1217_v43  ;;  %v2351_v43 = vld [vmem:[%s561_s20] sm:$0xff]  }
 0x72f   : > { %1323 = vrot.lane.b32.xlu0 %v3336_v15, %s2801_s29 }
 0x733   : > { %1321 = vrot.lane.b32.xlu0 %v3342_v20, %s2801_s29  ;;  %v2003_v20 = vld [vmem:[%s3289_s13 + $0x8] sm:$0xf] }
 0x734   : > { %v1278_v50 = vsel %vm907_vm4, %v2003_v20, 0 }
 0x735   : > { %2149 = vmatpush3.bf16.msra.mxu1 %v1278_v50 }
 0x736   : > { %2160 = vmatprep.subr.bf16.mxu1 %v2797_v2 }
 0x7a6   : > { %v1219_v44 = vpop.xlane.xlu0 %1218 }
 0x7a7   : > { %2371 = vrcp.f32 %v1219_v44  ;;  %v2352_v44 = vld [vmem:[%s561_s20 + $0x8] sm:$0xff]  }
 0x7aa   : > { %v1324_v47 = vpop.permute.xlu0 %1323 }
 0x7ab   : > { %v1329_v49 = vsel %vm845_vm3, %v1324_v47, 0  ;;  %v2356_v47 = vld [vmem:[%s3293_s12 + $0x18] sm:$0xff]  }
 0x7ae   : > { %v1322_v15 = vpop.permute.xlu0 %1321 }
 0x7b1   : > { %v2372_v45 = vpop.eup %2371 }
 0x7b2   : > { %v1221_v46 = vmul.f32 %v2372_v45, %v2370_v42  ;;  %v2354_v45 = vld [vmem:[%s3293_s12 + $0x8] sm:$0xff]  }
 0x7b4   : > { %v1222_v48 = vpack.c.bf16 %v1221_v46, %v1221_v46  ;;  %v2355_v46 = vld [vmem:[%s3293_s12 + $0x10] sm:$0xff]  }
 0x7b6   : > { %2145 = vmatmul.mubr.msk.bf16.vlgmr.msra.gmra.mrb[12].mxu0 %vm845_vm3, %v1222_v48  ;;  %v2357_v48 = vld [vmem:[%s3293_s12 + $0x20] sm:$0xff]  }
 0x7b7   : > { %2155 = vmatpush3.bf16.xpose.msra.mxu0 %v1329_v49  ;;  %2156 = vmatprep.mubr.msk.bf16.mxu0 %vm2798_vm1, %v2797_v2  ;;  %v2358_v49 = vld [vmem:[%s3293_s12 + $0x28] sm:$0xff]  }
 0x7b8   : > { %2166 = vmatprep.subr.bf16.mxu0 %v2797_v2 }
 0x7be   : > { %2157 = vmatmul.mubr.msk.bf16.vlgmr.msra.gmra.mrb[16].mxu0 %vm845_vm3, %v1322_v15 }
 0x7bf   : > { %2168 = vmatprep.mubr.msk.bf16.mxu0 %vm2798_vm1, %v2797_v2 }
 0x889   : > { %v1265_v51 = vpop.f32.mrb[12].mxu0 }
 0x88a   : > { %v1271_v52 = vpack.c.bf16 %v1265_v51, %v1265_v51  ;;  %v2146_v53 = vpop.f32.mrb[13].mxu0  ;;  %v1503_v51 = vsub.s32 2, %v3441_v24 }
 0x88b   : > { %v1268_v54 = vpop.f32.mrb[14].mxu0 }
 0x88c   : > { %v2147_v55 = vpop.f32.mrb[15].mxu0  ;;  %2151 = vmatmul.mubr.msk.bf16.vlgmr.msra.gmra.mrb[28].mxu1 %vm845_vm3, %v1271_v52  ;;  %v1508_v52 = vsub.s32 3, %v3441_v24  ;;  %v1504_v53 = vrot.slane %v3445_v27, %v1503_v51 }
 0x88d   : > { %2162 = vmatprep.mubr.msk.bf16.mxu1 %vm2798_vm1, %v2797_v2 }
 0x891   : > { %v1365_v56 = vpop.f32.mrb[16].mxu0 }
 0x892   : > { %v1366_v57 = vadd.f32 %v1365_v56, %v3361_v30  ;;  %v2158_v58 = vpop.f32.mrb[17].mxu0  ;;  %v1438_v30 = vsel %vm907_vm4, %v2007_v5, 0  ;;  %v1509_v56 = vrot.slane %v3445_v27, %v1508_v52 }
 0x893   : > { %v1368_v59 = vpop.f32.mrb[18].mxu0  ;;  %2167 = vmatpush3.bf16.msra.mxu0 %v1438_v30 }
 0x894   : > { %v2159_v60 = vpop.f32.mrb[19].mxu0  ;;  %v1371_v61 = vsel %vm845_vm3, %v1366_v57, -inf  ;;  %2180 = vmatprep.subr.bf16.mxu0 %v2797_v2 }
 0x895   : > { %1372 = vmax.xlane.f32.xlu0 %v1371_v61  ;;  %v2359_v60 = vld [vmem:[%s3293_s12 + $0x30] sm:$0xff]   ;;  %v2360_v61 = vld [vmem:[%s3293_s12 + $0x38] sm:$0xff]  }
 0x922   : > { %v1373_v62 = vpop.xlane.xlu0 %1372 }
 0x923   : > { %v1374_v63 = vsub.f32 %v1366_v57, %v1373_v62  ;;  %v2009_v62 = vld [vmem:[%s569_s2] ss:$0 sm:$0xff] }
 0x925   : > { %v1375_v0 = vmul.f32 1.442695, %v1374_v63 }
 0x927   : > { %2373 = vpow2.f32 %v1375_v0 }
 0x931   : > { %v2374_v1 = vpop.eup %2373 }
 0x932   : > { %v1377_v3 = vsel %vm845_vm3, %v2374_v1, 0.0 }
 0x933   : > { %1378 = vadd.xlane.f32.xlu1 %v1377_v3 }
 0x944   : > { %1383 = vrot.lane.b32.xlu1 %v3351_v25, %s2801_s29 }
 0x95f   : > { %v1314_v6 = vpop.f32.mrb[28].mxu1 }
 0x960   : > { %v1320_v7 = vadd.f32 %v1314_v6, %v3401_v28  ;;  %v2152_v8 = vpop.f32.mrb[29].mxu1  ;;  %v1484_v28 = vrot.slane %v3445_v27, %v1483_v26  ;;  %v1704_v26 = vsub.s32 4, %v3441_v24 }
 0x961   : > { %v1317_v9 = vpop.f32.mrb[30].mxu1 }
 0x962   : > { %v2153_v10 = vpop.f32.mrb[31].mxu1 }
 0x9c0   : > { %v1379_v11 = vpop.xlane.xlu1 %1378 }
 0x9c1   : > { %2375 = vrcp.f32 %v1379_v11 }
 0x9c4   : > { %v1384_v12 = vpop.permute.xlu1 %1383 }
 0x9c5   : > { %v1389_v13 = vsel %vm907_vm4, %v1384_v12, 0 }
 0x9c6   : > { %2161 = vmatpush3.bf16.msra.mxu1 %v1389_v13 }
 0x9c7   : > { %2172 = vmatprep.subr.bf16.mxu1 %v2797_v2 }
 0x9cb   : > { %v2376_v25 = vpop.eup %2375 }
 0x9cc   : > { %v1381_v14 = vmul.f32 %v2376_v25, %v2374_v1 }
 0x9ce   : > { %v1382_v16 = vpack.c.bf16 %v1381_v14, %v1381_v14 }
 0x9d0   : > { %2163 = vmatmul.mubr.msk.bf16.vlgmr.msra.gmra.mrb[32].mxu1 %vm845_vm3, %v1382_v16 }
 0x9d1   : > { %2176 = vmatprep.mubr.msk.bf16.mxu1 %vm2798_vm1, %v2797_v2  ;;  %2173 = vmatpush3.bf16.msra.mxu1 %v2351_v43 }
 0x9d2   : > { %2174 = vmatprep.subr.bf16.mxu1 %v2797_v2 }
 0x9d5   : > { %2175 = vmatpush3.bf16.msra.mxu1 %v2352_v44 }
 0xaa3   : > { %v1425_v17 = vpop.f32.mrb[32].mxu1 }
 0xaa4   : > { %v1431_v18 = vpack.c.bf16 %v1425_v17, %v1425_v17  ;;  %v2164_v19 = vpop.f32.mrb[33].mxu1 }
 0xaa5   : > { %v1428_v21 = vpop.f32.mrb[34].mxu1 }
 0xaa6   : > { %v2165_v22 = vpop.f32.mrb[35].mxu1  ;;  %2169 = vmatmul.mubr.msk.bf16.vlgmr.msra.gmra.mrb[20].mxu0 %vm845_vm3, %v1431_v18 }
 0xaa7   : > { %2196 = vmatprep.mubr.msk.bf16.mxu0 %vm2798_vm1, %v2797_v2 }
 0xb79   : > { %v1474_v29 = vpop.f32.mrb[20].mxu0 }
 0xb7a   : > { %v1480_v31 = vadd.f32 %v1474_v29, %v1320_v7  ;;  %v2170_v32 = vpop.f32.mrb[21].mxu0  ;;  %v1598_v7 = vsub.s32 1, %v3441_v24  ;;  %v1705_v29 = vrot.slane %v3445_v27, %v1704_v26 }
 0xb7b   : > { %v1477_v33 = vpop.f32.mrb[22].mxu0 }
 0xb7c   : > { %v1485_v34 = vadd.f32 %v1484_v28, %v1480_v31  ;;  %v2171_v35 = vpop.f32.mrb[23].mxu0  ;;  %v1599_v8 = vrot.slane %v3445_v27, %v1598_v7  ;;  %v1709_v28 = vsub.s32 5, %v3441_v24 }
 0xb7e   : > { %v1486_v36 = vadd.f32 %v1485_v34, %v3310_v4  ;;  %v2353_v4 = vld [vmem:[%s3293_s12] sm:$0xff]   ;;  %v1710_v33 = vrot.slane %v3445_v27, %v1709_v28 }
 0xb7f   : > { %2181 = vmatpush3.bf16.msra.mxu0 %v2353_v4 }
 0xb80   : > { %v1487_v37 = vsel %vm685_vm2, %v1486_v36, 0.0  ;;  %2182 = vmatprep.subr.bf16.mxu0 %v2797_v2 }
 0xb81   : > { %1488 = vadd.xlane.f32.xlu1 %v1487_v37 }
 0xb83   : > { %2183 = vmatpush3.bf16.msra.mxu0 %v2354_v45 }
 0xb84   : > { %2184 = vmatprep.subr.bf16.mxu0 %v2797_v2 }
 0xb87   : > { %2185 = vmatpush3.bf16.msra.mxu0 %v2355_v46 }
 0xb88   : > { %2186 = vmatprep.subr.bf16.mxu0 %v2797_v2 }
 0xb8b   : > { %2187 = vmatpush3.bf16.msra.mxu0 %v2356_v47 }
 0xb8c   : > { %2188 = vmatprep.subr.bf16.mxu0 %v2797_v2 }
 0xb8f   : > { %2189 = vmatpush3.bf16.msra.mxu0 %v2357_v48 }
 0xb90   : > { %2190 = vmatprep.subr.bf16.mxu0 %v2797_v2 }
 0xb93   : > { %2191 = vmatpush3.bf16.msra.mxu0 %v2358_v49 }
 0xb94   : > { %2192 = vmatprep.subr.bf16.mxu0 %v2797_v2 }
 0xb97   : > { %2193 = vmatpush3.bf16.msra.mxu0 %v2359_v60 }
 0xb98   : > { %2194 = vmatprep.subr.bf16.mxu0 %v2797_v2 }
 0xb9b   : > { %2195 = vmatpush3.bf16.msra.mxu0 %v2360_v61 }
 0xc0e   : > { %v1489_v38 = vpop.xlane.xlu1 %1488 }
 0xc0f   : > { %v1491_v39 = vmul.f32 0.03125, %v1489_v38 }
 0xc11   : > { %v1492_v40 = vsub.f32 %v1486_v36, %v1491_v39 }
 0xc13   : > { %v1493_v41 = vmul.f32 %v1492_v40, %v1492_v40 }
 0xc15   : > { %v1494_v42 = vsel %vm685_vm2, %v1493_v41, 0.0 }
 0xc16   : > { %1495 = vadd.xlane.f32.xlu0 %v1494_v42 }
 0xca3   : > { %v1496_v15 = vpop.xlane.xlu0 %1495 }
 0xca4   : > { %v1497_v20 = vmul.f32 0.03125, %v1496_v15 }
 0xca6   : > { %v1498_v50 = vadd.f32 1e-05, %v1497_v20 }
 0xca8   : > { %2377 = vrsqrt.f32 %v1498_v50 }
 0xcb2   : > { %v2378_v54 = vpop.eup %2377 }
 0xcb3   : > { %v1500_v55 = vmul.f32 %v2378_v54, %v1492_v40 }
 0xcb5   : > { %v1505_v57 = vmul.f32 %v1504_v53, %v1500_v55 }
 0xcb7   : > { %v1510_v58 = vadd.f32 %v1509_v56, %v1505_v57 }
 0xcb9   : > { %v1511_v59 = vpack.c.bf16 %v1510_v58, %v1510_v58 }
 0xcbb   : > { %2177 = vmatmul.mubr.msk.bf16.vlgmr.msra.gmra.mrb[36].mxu1 %vm685_vm2, %v1511_v59 }
 0xd8e   : > { %v1572_v63 = vpop.f32.mrb[36].mxu1 }
 0xd8f   : > { %v1573_v0 = vadd.f32 %v2009_v62, %v1572_v63  ;;  %v2178_v1 = vpop.f32.mrb[37].mxu1 }
 0xd90   : > { %v1575_v3 = vpop.f32.mrb[38].mxu1 }
 0xd91   : > { %v1578_v5 = vmax.f32 %v1573_v0, 0.0  ;;  %v2179_v30 = vpop.f32.mrb[39].mxu1 }
 0xd93   : > { %v1579_v6 = vpack.c.bf16 %v1578_v5, %v1578_v5 }
 0xd95   : > { %2197 = vmatmul.mubr.bf16.vlgmr.msra.gmra.mrb[24].mxu0 %v1579_v6 }
 0xe68   : > { %v1682_v9 = vpop.f32.mrb[24].mxu0 }
 0xe69   : > { %v1683_v10 = vadd.f32 %v1682_v9, %v1599_v8  ;;  %v2198_v11 = vpop.f32.mrb[25].mxu0 }
 0xe6a   : > { %v1685_v2 = vpop.f32.mrb[26].mxu0 }
 0xe6b   : > { %v2199_v12 = vpop.f32.mrb[27].mxu0  ;;  %v1688_v13 = vadd.f32 %v1683_v10, %v1510_v58 }
 0xe6d   : > { %v1689_v25 = vsel %vm685_vm2, %v1688_v13, 0.0 }
 0xe6e   : > { %1690 = vadd.xlane.f32.xlu0 %v1689_v25 }
 0xefb   : > { %v1691_v14 = vpop.xlane.xlu0 %1690 }
 0xefc   : > { %v1692_v16 = vmul.f32 0.03125, %v1691_v14 }
 0xefe   : > { %v1693_v17 = vsub.f32 %v1688_v13, %v1692_v16 }
 0xf00   : > { %v1694_v18 = vmul.f32 %v1693_v17, %v1693_v17 }
 0xf02   : > { %v1695_v19 = vsel %vm685_vm2, %v1694_v18, 0.0 }
 0xf03   : > { %1696 = vadd.xlane.f32.xlu0 %v1695_v19 }
 0xf90   : > { %v1697_v21 = vpop.xlane.xlu0 %1696 }
 0xf91   : > { %v1698_v22 = vmul.f32 0.03125, %v1697_v21 }
 0xf93   : > { %v1699_v23 = vadd.f32 1e-05, %v1698_v22 }
 0xf95   : > { %2379 = vrsqrt.f32 %v1699_v23 }
 0xf9f   : > { %v2380_v31 = vpop.eup %2379 }
 0xfa0   : > { %v1701_v32 = vmul.f32 %v2380_v31, %v1693_v17 }
 0xfa2   : > { %v1706_v34 = vmul.f32 %v1705_v29, %v1701_v32 }
 0xfa4   : > { %v1711_v35 = vadd.f32 %v1710_v33, %v1706_v34 }
 0xfa6   : > { %1712 = vst.msk [vmem:[%s3307_s3] sm:$0xff] %vm685_vm2, %v1711_v35 }
 0xfa7   : > { %2690 = shalt.err (!%p2687_p10)
}
 0xfa8   : > { %s3604_s17 = sld [smem:[#allocation33_spill]] }
 0xfae   : > { %s3605_s5 = smov %s3604_s17  ;;  %s2691_s13 = scalar_lea.hbm %s3604_s17, 256 }
 0xfaf   : > { %p2692_p5 = scmp.ne.s32.totalorder %s3605_s5, %s2691_s13  ;;  %p2697_p1 = scmp.lt.u32.totalorder %s2691_s13, %s3605_s5 }
 0xfb1   : > { %p2693_p9 = pnand %p2692_p5, %p2265_p7 }
 0xfb3   : > { %p2694_p12 = pneg %p2693_p9 }
 0xfb5   : > { %p2699_p4 = pnand %p2697_p1, %p2694_p12 }
 0xfb7   : > { %2702 = shalt.err (!%p2699_p4)
}
 0xfb8   : > { %s2803_s26 = smov 128   ;;  %s2804_s15 = smov 8  }
 0xfb9   : > { %2225 = dma.vmem_to_hbm [thread:$0]  (%p2265_p7), %s1720_s28, 256, %s3605_s5, [#allocation4], %s2803_s26, %s2803_s26, %s2804_s15  }
 0xfba   : > { %2748 = dma.done.wait (%p2265_p7), [#allocation4], 256  }
 0xfbb   : > { %2750 = vsyncadd (%p2265_p7), [#allocation4], 4294967040 }
 0xfbc PF: > { %s3606_s18 = sld [smem:[#allocation24_spill]]  ;;  %s3607_s11 = sld [smem:[#allocation20_spill]] }
 0xfbd   : > { %s3608_s15 = sld [smem:[#allocation27_spill]]  ;;  %s3609_s16 = sld [smem:[#allocation23_spill]] }
 0xfbe   : > { %s3611_s4 = sld [smem:[#allocation26_spill]]  ;;  %s3612_s13 = smov %s2757_s14 }
 0xfbf   : > { %s3614_s17 = smov %s2777_s19 }
 0xfc2   : > { %s23_s20 = sadd.s32 1, %s3606_s18   ;;  %s3610_s18 = sld [smem:[#allocation25_spill]] }
 0xfc3   : > { %p20_p3 = scmp.ge.s32.totalorder %s23_s20, 6   ;;  %s3613_s14 = smov %s3607_s11 }
 0xfc4   : > { %s3615_s19 = smov %s3611_s4 }
 0xfc5   :  { %22 = sbr.rel (!%p20_p3) target bundleno = 13 (0xd), region = 191 }
 0xfcc   :  { %1735 = vsyncpa [#allocation3], 1 }
 0xfcd   :  { %1737 = vsyncpa [#allocation3 + $0x1], 1 }
 0xfce   :  { %1738 = vsyncpa [#allocation6], 1 }
 0xfcf   :  { %1739 = vsyncpa [#allocation4], 1 }
 0xfd0   :  { %1741 = vsyncpa [#allocation4 + $0x1], 1 }

</bundles_post_ra>
